<compile_context>
chip_gen: v7x
topology: tpu7x:2x2x1
jax: 0.10.0
libtpu: 0.0.40
codegen_flags: <defaults>
</compile_context>

<pallas_src>
import numpy as np
import jax
import jax.numpy as jnp
from jax.experimental import pallas as pl
from jax.experimental.pallas import tpu as pltpu

# ---- model hyper-parameters (small, consistent with the module's __init__) ----
B, T, S, D = 2, 8, 16, 32          # batch, decoder seq, encoder seq, dim_model
H = 4                              # num attention heads
DH = D // H                        # head dim
FF_RATIO = 4
F = D * FF_RATIO                   # dim_ffn
EPS = 1e-5                         # nn.LayerNorm default eps

BT = B * T
BS = B * S

# Row indices of the packed bias / LayerNorm slab (shape (13, F), lane-padded).
_LN1G, _LN1B, _LN2G, _LN2B, _LN3G, _LN3B = 0, 1, 2, 3, 4, 5
_BO1, _BQ2, _BO2, _B2F = 6, 7, 8, 9
_BQKV1, _BKV2, _B1F = 10, 11, 12
_N_BIAS_ROWS = 13


def _layernorm(z, g, b):
    mu = jnp.mean(z, axis=-1, keepdims=True)
    var = jnp.mean((z - mu) ** 2, axis=-1, keepdims=True)
    return (z - mu) * jax.lax.rsqrt(var + EPS) * g + b


def _mha(q, k, v, tq, tk, acc_ref):
    """Multi-head attention on flattened rows.

    q: (B*tq, D); k, v: (B*tk, D).  Per-head contexts are written into the
    (B*T, D) VMEM scratch `acc_ref` so the caller does ONE output-projection
    matmul.  Returns (context, attention maps) with maps stacked row-major over
    (batch, head, query) as (B*H*tq, tk) for a single contiguous store.
    """
    scale = 1.0 / (DH ** 0.5)
    map_blocks = []
    for b in range(B):
        qb = q[b * tq:(b + 1) * tq]                 # (tq, D) sublane slice
        kb = k[b * tk:(b + 1) * tk]
        vb = v[b * tk:(b + 1) * tk]
        for h in range(H):
            sl = slice(h * DH, (h + 1) * DH)
            s = jnp.dot(qb[:, sl], kb[:, sl].T,
                        preferred_element_type=jnp.float32) * scale
            s = s - jnp.max(s, axis=-1, keepdims=True)
            e = jnp.exp(s)
            w = e * pl.reciprocal(jnp.sum(e, axis=-1, keepdims=True),
                                  approx=True)
            map_blocks.append(w)
            acc_ref[b * tq:(b + 1) * tq, sl] = jnp.dot(
                w, vb[:, sl], preferred_element_type=jnp.float32)
    return acc_ref[...], jnp.concatenate(map_blocks, axis=0)


def _block_kernel(x_ref, xe_ref, wdd_ref, wqkv1_ref, wkv2_ref, w1f_ref,
                  w2f_ref, bias_ref, out_ref, smap_ref, cmap_ref, acc_ref):
    x = x_ref[...]      # (B*T, D) flattened decoder rows
    xe = xe_ref[...]    # (B*S, D) flattened encoder rows

    def brow(r, width):
        return bias_ref[r:r + 1, :width]   # (1, width) row, broadcasts over rows

    # ---------------- self-attention module (pre-norm, residual) --------------
    y = _layernorm(x, brow(_LN1G, D), brow(_LN1B, D))
    qkv = jnp.dot(y, wqkv1_ref[...],
                  preferred_element_type=jnp.float32) + brow(_BQKV1, 3 * D)
    ctx, smap = _mha(qkv[:, 0:D], qkv[:, D:2 * D], qkv[:, 2 * D:3 * D],
                     T, T, acc_ref)
    x = x + jnp.dot(ctx, wdd_ref[0],
                    preferred_element_type=jnp.float32) + brow(_BO1, D)

    # ------------- cross-attention (Q from LN(x), K/V from raw x_enc) ---------
    y = _layernorm(x, brow(_LN2G, D), brow(_LN2B, D))
    q = jnp.dot(y, wdd_ref[1],
                preferred_element_type=jnp.float32) + brow(_BQ2, D)
    kv = jnp.dot(xe, wkv2_ref[...],
                 preferred_element_type=jnp.float32) + brow(_BKV2, 2 * D)
    ctx, cmap = _mha(q, kv[:, 0:D], kv[:, D:2 * D], T, S, acc_ref)
    x = x + jnp.dot(ctx, wdd_ref[2],
                    preferred_element_type=jnp.float32) + brow(_BO2, D)

    # ---------------- feed-forward module (LN -> Linear -> ReLU -> Linear) ----
    y = _layernorm(x, brow(_LN3G, D), brow(_LN3B, D))
    hdn = jnp.maximum(
        jnp.dot(y, w1f_ref[...], preferred_element_type=jnp.float32)
        + brow(_B1F, F), 0.0)
    x = x + jnp.dot(hdn, w2f_ref[...],
                    preferred_element_type=jnp.float32) + brow(_B2F, D)

    # single store per output; wrapper reshapes back to (B, ...) views
    out_ref[...] = x
    smap_ref[...] = smap
    cmap_ref[...] = cmap


def _pack_params(p):
    """26 module parameters -> 6 packed kernel operands."""
    def pad_to_f(v):
        return jnp.pad(v, ((0, 0), (0, F - v.shape[1])))

    w_qkv1 = jnp.concatenate([p["wq1"], p["wk1"], p["wv1"]], axis=1)   # (D, 3D)
    w_kv2 = jnp.concatenate([p["wk2"], p["wv2"]], axis=1)              # (D, 2D)
    w_dd = jnp.stack([p["wo1"], p["wq2"], p["wo2"]], axis=0)           # (3, D, D)
    bias_slab = jnp.concatenate([
        pad_to_f(p["ln1_g"]), pad_to_f(p["ln1_b"]),
        pad_to_f(p["ln2_g"]), pad_to_f(p["ln2_b"]),
        pad_to_f(p["ln3_g"]), pad_to_f(p["ln3_b"]),
        pad_to_f(p["bo1"]), pad_to_f(p["bq2"]),
        pad_to_f(p["bo2"]), pad_to_f(p["b2f"]),
        pad_to_f(jnp.concatenate([p["bq1"], p["bk1"], p["bv1"]], axis=1)),
        pad_to_f(jnp.concatenate([p["bk2"], p["bv2"]], axis=1)),
        p["b1f"],
    ], axis=0)                                                         # (13, F)
    return w_dd, w_qkv1, w_kv2, p["w1f"], p["w2f"], bias_slab


@jax.jit
def cross_transformer_block(x, x_enc, params):
    w_dd, w_qkv1, w_kv2, w1f, w2f, bias_slab = _pack_params(params)

    vmem = pl.BlockSpec(memory_space=pltpu.MemorySpace.VMEM)   # whole array in VMEM
    out_flat, smap_flat, cmap_flat = pl.pallas_call(
        _block_kernel,
        out_shape=(
            jax.ShapeDtypeStruct((BT, D), jnp.float32),
            jax.ShapeDtypeStruct((B * H * T, T), jnp.float32),
            jax.ShapeDtypeStruct((B * H * T, S), jnp.float32),
        ),
        in_specs=[vmem] * 8,
        out_specs=(vmem, vmem, vmem),
        scratch_shapes=[pltpu.VMEM((BT, D), jnp.float32)],
    )(x.reshape(BT, D), x_enc.reshape(BS, D),
      w_dd, w_qkv1, w_kv2, w1f, w2f, bias_slab)

    out = out_flat.reshape(B, T, D)
    att_maps = {"self": smap_flat.reshape(B, H, T, T),
                "cross": cmap_flat.reshape(B, H, T, S)}
    hidden = None  # TODO(synk): streaming `hidden` state and optional mask/mask_enc are pass-through (None / unused), matching eval-mode usage.
    return out, att_maps, hidden


# -------------------------- pure-JAX reference ---------------------------------
def reference_forward(x, x_enc, p):
    def ln(z, g, b):
        mu = z.mean(-1, keepdims=True)
        var = ((z - mu) ** 2).mean(-1, keepdims=True)
        return (z - mu) / jnp.sqrt(var + EPS) * g + b

    def mha(q, k, v):
        Bq, Tq, _ = q.shape
        Tk = k.shape[1]
        qh = q.reshape(Bq, Tq, H, DH).transpose(0, 2, 1, 3)
        kh = k.reshape(Bq, Tk, H, DH).transpose(0, 2, 1, 3)
        vh = v.reshape(Bq, Tk, H, DH).transpose(0, 2, 1, 3)
        s = jnp.einsum("bhqd,bhkd->bhqk", qh, kh,
                       precision=jax.lax.Precision.HIGHEST) / (DH ** 0.5)
        w = jax.nn.softmax(s, axis=-1)
        o = jnp.einsum("bhqk,bhkd->bhqd", w, vh,
                       precision=jax.lax.Precision.HIGHEST)
        return o.transpose(0, 2, 1, 3).reshape(Bq, Tq, D), w

    hi = jax.lax.Precision.HIGHEST
    mm = lambda a, b: jnp.matmul(a, b, precision=hi)

    # self-attention
    y = ln(x, p["ln1_g"], p["ln1_b"])
    q, k, v = mm(y, p["wq1"]) + p["bq1"], mm(y, p["wk1"]) + p["bk1"], mm(y, p["wv1"]) + p["bv1"]
    o, smap = mha(q, k, v)
    x = x + mm(o, p["wo1"]) + p["bo1"]
    # cross-attention (K/V from raw encoder output)
    y = ln(x, p["ln2_g"], p["ln2_b"])
    q = mm(y, p["wq2"]) + p["bq2"]
    k = mm(x_enc, p["wk2"]) + p["bk2"]
    v = mm(x_enc, p["wv2"]) + p["bv2"]
    o, cmap = mha(q, k, v)
    x = x + mm(o, p["wo2"]) + p["bo2"]
    # feed-forward
    y = ln(x, p["ln3_g"], p["ln3_b"])
    x = x + mm(jnp.maximum(mm(y, p["w1f"]) + p["b1f"], 0.0), p["w2f"]) + p["b2f"]
    return x, smap, cmap


def make_params(key):
    shapes = {
        "ln1_g": (1, D), "ln1_b": (1, D),
        "wq1": (D, D), "bq1": (1, D), "wk1": (D, D), "bk1": (1, D),
        "wv1": (D, D), "bv1": (1, D), "wo1": (D, D), "bo1": (1, D),
        "ln2_g": (1, D), "ln2_b": (1, D),
        "wq2": (D, D), "bq2": (1, D), "wk2": (D, D), "bk2": (1, D),
        "wv2": (D, D), "bv2": (1, D), "wo2": (D, D), "bo2": (1, D),
        "ln3_g": (1, D), "ln3_b": (1, D),
        "w1f": (D, F), "b1f": (1, F), "w2f": (F, D), "b2f": (1, D),
    }
    params = {}
    keys = jax.random.split(key, len(shapes))
    for (name, shape), k in zip(shapes.items(), keys):
        if name.startswith("ln") and name.endswith("_g"):
            params[name] = jnp.ones(shape, jnp.float32) + 0.1 * jax.random.normal(k, shape, jnp.float32)
        elif name.startswith("ln") and name.endswith("_b"):
            params[name] = 0.1 * jax.random.normal(k, shape, jnp.float32)
        elif name.startswith("b"):
            params[name] = 0.05 * jax.random.normal(k, shape, jnp.float32)
        else:  # weight matrices: scale by 1/sqrt(fan_in)
            fan_in = shape[0]
            params[name] = jax.random.normal(k, shape, jnp.float32) / np.sqrt(fan_in)
    return params


if __name__ == "__main__":
    root = jax.random.PRNGKey(0)
    k_x, k_enc, k_p = jax.random.split(root, 3)
    x = jax.random.normal(k_x, (B, T, D), jnp.float32)
    x_enc = jax.random.normal(k_enc, (B, S, D), jnp.float32)
    params = make_params(k_p)

    out, att_maps, hidden = cross_transformer_block(x, x_enc, params)
    out = jax.block_until_ready(out)
    smap = jax.block_until_ready(att_maps["self"])
    cmap = jax.block_until_ready(att_maps["cross"])

    ref_out, ref_smap, ref_cmap = reference_forward(x, x_enc, params)
    np.testing.assert_allclose(np.asarray(out), np.asarray(ref_out), rtol=1e-2, atol=1e-2)
    np.testing.assert_allclose(np.asarray(smap), np.asarray(ref_smap), rtol=1e-2, atol=1e-2)
    np.testing.assert_allclose(np.asarray(cmap), np.asarray(ref_cmap), rtol=1e-2, atol=1e-2)

    print("KERNEL_OK")
</pallas_src>

<mosaic_0001>
module attributes {stable_mosaic.version = 11 : i64} {
  func.func @_block_kernel(%arg0: memref<16x32xf32, #tpu.memory_space<vmem>>, %arg1: memref<32x32xf32, #tpu.memory_space<vmem>>, %arg2: memref<3x32x32xf32, #tpu.memory_space<vmem>>, %arg3: memref<32x96xf32, #tpu.memory_space<vmem>>, %arg4: memref<32x64xf32, #tpu.memory_space<vmem>>, %arg5: memref<32x128xf32, #tpu.memory_space<vmem>>, %arg6: memref<128x32xf32, #tpu.memory_space<vmem>>, %arg7: memref<13x128xf32, #tpu.memory_space<vmem>>, %arg8: memref<16x32xf32, #tpu.memory_space<vmem>>, %arg9: memref<64x8xf32, #tpu.memory_space<vmem>>, %arg10: memref<64x16xf32, #tpu.memory_space<vmem>>, %arg11: memref<16x32xf32, #tpu.memory_space<vmem>>) attributes {dimension_semantics = [], scalar_prefetch = 0 : i64, scratch_operands = 1 : i64, tpu.core_type = #tpu.core_type<tc>} {
    %c0 = arith.constant 0 : index
    %c0_0 = arith.constant 0 : index
    %0 = vector.load %arg0[%c0, %c0_0] : memref<16x32xf32, #tpu.memory_space<vmem>>, vector<16x32xf32>
    %c0_1 = arith.constant 0 : index
    %c0_2 = arith.constant 0 : index
    %1 = vector.load %arg1[%c0_1, %c0_2] : memref<32x32xf32, #tpu.memory_space<vmem>>, vector<32x32xf32>
    %c0_3 = arith.constant 0 : index
    %c0_4 = arith.constant 0 : index
    %2 = vector.load %arg7[%c0_3, %c0_4] : memref<13x128xf32, #tpu.memory_space<vmem>>, vector<1x32xf32>
    %c1 = arith.constant 1 : index
    %c0_5 = arith.constant 0 : index
    %3 = vector.load %arg7[%c1, %c0_5] : memref<13x128xf32, #tpu.memory_space<vmem>>, vector<1x32xf32>
    %cst = arith.constant dense<0.000000e+00> : vector<16xf32>
    %4 = vector.multi_reduction <add>, %0, %cst [1] : vector<16x32xf32> to vector<16xf32>
    %5 = vector.shape_cast %4 : vector<16xf32> to vector<16x1xf32>
    %cst_6 = arith.constant 3.200000e+01 : f32
    %6 = vector.broadcast %cst_6 : f32 to vector<16x1xf32>
    %7 = arith.divf %5, %6 : vector<16x1xf32>
    %8 = vector.broadcast %7 : vector<16x1xf32> to vector<16x32xf32>
    %9 = arith.subf %0, %8 : vector<16x32xf32>
    %10 = arith.mulf %9, %9 : vector<16x32xf32>
    %cst_7 = arith.constant dense<0.000000e+00> : vector<16xf32>
    %11 = vector.multi_reduction <add>, %10, %cst_7 [1] : vector<16x32xf32> to vector<16xf32>
    %12 = vector.shape_cast %11 : vector<16xf32> to vector<16x1xf32>
    %cst_8 = arith.constant 3.200000e+01 : f32
    %13 = vector.broadcast %cst_8 : f32 to vector<16x1xf32>
    %14 = arith.divf %12, %13 : vector<16x1xf32>
    %15 = vector.broadcast %7 : vector<16x1xf32> to vector<16x32xf32>
    %16 = arith.subf %0, %15 : vector<16x32xf32>
    %cst_9 = arith.constant 9.99999974E-6 : f32
    %17 = vector.broadcast %cst_9 : f32 to vector<16x1xf32>
    %18 = arith.addf %14, %17 : vector<16x1xf32>
    %19 = math.rsqrt %18 : vector<16x1xf32>
    %20 = vector.broadcast %19 : vector<16x1xf32> to vector<16x32xf32>
    %21 = arith.mulf %16, %20 : vector<16x32xf32>
    %22 = vector.broadcast %2 : vector<1x32xf32> to vector<16x32xf32>
    %23 = arith.mulf %21, %22 : vector<16x32xf32>
    %24 = vector.broadcast %3 : vector<1x32xf32> to vector<16x32xf32>
    %25 = arith.addf %23, %24 : vector<16x32xf32>
    %c0_10 = arith.constant 0 : index
    %c0_11 = arith.constant 0 : index
    %26 = vector.load %arg3[%c0_10, %c0_11] : memref<32x96xf32, #tpu.memory_space<vmem>>, vector<32x96xf32>
    %cst_12 = arith.constant dense<0.000000e+00> : vector<16x96xf32>
    %27 = tpu.matmul %25, %26, %cst_12 {dimension_numbers = #tpu.dot_dimension_numbers<[1], [0], [0], [1], [0, 0, 1, 1], [], []>} : vector<16x32xf32>, vector<32x96xf32>, vector<16x96xf32> -> vector<16x96xf32>
    %c10 = arith.constant 10 : index
    %c0_13 = arith.constant 0 : index
    %28 = vector.load %arg7[%c10, %c0_13] : memref<13x128xf32, #tpu.memory_space<vmem>>, vector<1x96xf32>
    %29 = vector.broadcast %28 : vector<1x96xf32> to vector<16x96xf32>
    %30 = arith.addf %27, %29 : vector<16x96xf32>
    %31 = vector.extract_strided_slice %30 {offsets = [0, 0], sizes = [16, 32], strides = [1, 1]} : vector<16x96xf32> to vector<16x32xf32>
    %32 = vector.extract_strided_slice %30 {offsets = [0, 32], sizes = [16, 32], strides = [1, 1]} : vector<16x96xf32> to vector<16x32xf32>
    %33 = vector.extract_strided_slice %30 {offsets = [0, 64], sizes = [16, 32], strides = [1, 1]} : vector<16x96xf32> to vector<16x32xf32>
    %34 = vector.extract_strided_slice %31 {offsets = [0, 0], sizes = [8, 32], strides = [1, 1]} : vector<16x32xf32> to vector<8x32xf32>
    %35 = vector.extract_strided_slice %32 {offsets = [0, 0], sizes = [8, 32], strides = [1, 1]} : vector<16x32xf32> to vector<8x32xf32>
    %36 = vector.extract_strided_slice %33 {offsets = [0, 0], sizes = [8, 32], strides = [1, 1]} : vector<16x32xf32> to vector<8x32xf32>
    %37 = vector.extract_strided_slice %34 {offsets = [0, 0], sizes = [8, 8], strides = [1, 1]} : vector<8x32xf32> to vector<8x8xf32>
    %38 = vector.extract_strided_slice %35 {offsets = [0, 0], sizes = [8, 8], strides = [1, 1]} : vector<8x32xf32> to vector<8x8xf32>
    %39 = tpu.transpose %38, [1, 0] : vector<8x8xf32> -> vector<8x8xf32>
    %cst_14 = arith.constant dense<0.000000e+00> : vector<8x8xf32>
    %40 = tpu.matmul %37, %39, %cst_14 {dimension_numbers = #tpu.dot_dimension_numbers<[1], [0], [0], [1], [0, 0, 1, 1], [], []>} : vector<8x8xf32>, vector<8x8xf32>, vector<8x8xf32> -> vector<8x8xf32>
    %cst_15 = arith.constant 0.353553385 : f32
    %41 = vector.broadcast %cst_15 : f32 to vector<8x8xf32>
    %42 = arith.mulf %40, %41 : vector<8x8xf32>
    %cst_16 = arith.constant dense<0xFF800000> : vector<8xf32>
    %43 = vector.multi_reduction <maximumf>, %42, %cst_16 [1] : vector<8x8xf32> to vector<8xf32>
    %44 = vector.shape_cast %43 : vector<8xf32> to vector<8x1xf32>
    %45 = vector.broadcast %44 : vector<8x1xf32> to vector<8x8xf32>
    %46 = arith.subf %42, %45 : vector<8x8xf32>
    %47 = math.exp %46 : vector<8x8xf32>
    %cst_17 = arith.constant dense<0.000000e+00> : vector<8xf32>
    %48 = vector.multi_reduction <add>, %47, %cst_17 [1] : vector<8x8xf32> to vector<8xf32>
    %49 = vector.shape_cast %48 : vector<8xf32> to vector<8x1xf32>
    %50 = tpu.reciprocal %49 {approx = true} : vector<8x1xf32> -> vector<8x1xf32>
    %51 = vector.broadcast %50 : vector<8x1xf32> to vector<8x8xf32>
    %52 = arith.mulf %47, %51 : vector<8x8xf32>
    %53 = vector.extract_strided_slice %36 {offsets = [0, 0], sizes = [8, 8], strides = [1, 1]} : vector<8x32xf32> to vector<8x8xf32>
    %cst_18 = arith.constant dense<0.000000e+00> : vector<8x8xf32>
    %54 = tpu.matmul %52, %53, %cst_18 {dimension_numbers = #tpu.dot_dimension_numbers<[1], [0], [0], [1], [0, 0, 1, 1], [], []>} : vector<8x8xf32>, vector<8x8xf32>, vector<8x8xf32> -> vector<8x8xf32>
    %c0_19 = arith.constant 0 : index
    %c0_20 = arith.constant 0 : index
    %55 = vector.load %arg11[%c0_19, %c0_20] : memref<16x32xf32, #tpu.memory_space<vmem>>, vector<8x8xf32>
    tpu.vector_store %arg11[%c0_19, %c0_20], %54 {strides = array<i32>} : memref<16x32xf32, #tpu.memory_space<vmem>>, vector<8x8xf32>,
    %56 = vector.extract_strided_slice %34 {offsets = [0, 8], sizes = [8, 8], strides = [1, 1]} : vector<8x32xf32> to vector<8x8xf32>
    %57 = vector.extract_strided_slice %35 {offsets = [0, 8], sizes = [8, 8], strides = [1, 1]} : vector<8x32xf32> to vector<8x8xf32>
    %58 = tpu.transpose %57, [1, 0] : vector<8x8xf32> -> vector<8x8xf32>
    %cst_21 = arith.constant dense<0.000000e+00> : vector<8x8xf32>
    %59 = tpu.matmul %56, %58, %cst_21 {dimension_numbers = #tpu.dot_dimension_numbers<[1], [0], [0], [1], [0, 0, 1, 1], [], []>} : vector<8x8xf32>, vector<8x8xf32>, vector<8x8xf32> -> vector<8x8xf32>
    %cst_22 = arith.constant 0.353553385 : f32
    %60 = vector.broadcast %cst_22 : f32 to vector<8x8xf32>
    %61 = arith.mulf %59, %60 : vector<8x8xf32>
    %cst_23 = arith.constant dense<0xFF800000> : vector<8xf32>
    %62 = vector.multi_reduction <maximumf>, %61, %cst_23 [1] : vector<8x8xf32> to vector<8xf32>
    %63 = vector.shape_cast %62 : vector<8xf32> to vector<8x1xf32>
    %64 = vector.broadcast %63 : vector<8x1xf32> to vector<8x8xf32>
    %65 = arith.subf %61, %64 : vector<8x8xf32>
    %66 = math.exp %65 : vector<8x8xf32>
    %cst_24 = arith.constant dense<0.000000e+00> : vector<8xf32>
    %67 = vector.multi_reduction <add>, %66, %cst_24 [1] : vector<8x8xf32> to vector<8xf32>
    %68 = vector.shape_cast %67 : vector<8xf32> to vector<8x1xf32>
    %69 = tpu.reciprocal %68 {approx = true} : vector<8x1xf32> -> vector<8x1xf32>
    %70 = vector.broadcast %69 : vector<8x1xf32> to vector<8x8xf32>
    %71 = arith.mulf %66, %70 : vector<8x8xf32>
    %72 = vector.extract_strided_slice %36 {offsets = [0, 8], sizes = [8, 8], strides = [1, 1]} : vector<8x32xf32> to vector<8x8xf32>
    %cst_25 = arith.constant dense<0.000000e+00> : vector<8x8xf32>
    %73 = tpu.matmul %71, %72, %cst_25 {dimension_numbers = #tpu.dot_dimension_numbers<[1], [0], [0], [1], [0, 0, 1, 1], [], []>} : vector<8x8xf32>, vector<8x8xf32>, vector<8x8xf32> -> vector<8x8xf32>
    %c0_26 = arith.constant 0 : index
    %c8 = arith.constant 8 : index
    %74 = vector.load %arg11[%c0_26, %c8] : memref<16x32xf32, #tpu.memory_space<vmem>>, vector<8x8xf32>
    tpu.vector_store %arg11[%c0_26, %c8], %73 {strides = array<i32>} : memref<16x32xf32, #tpu.memory_space<vmem>>, vector<8x8xf32>,
    %75 = vector.extract_strided_slice %34 {offsets = [0, 16], sizes = [8, 8], strides = [1, 1]} : vector<8x32xf32> to vector<8x8xf32>
    %76 = vector.extract_strided_slice %35 {offsets = [0, 16], sizes = [8, 8], strides = [1, 1]} : vector<8x32xf32> to vector<8x8xf32>
    %77 = tpu.transpose %76, [1, 0] : vector<8x8xf32> -> vector<8x8xf32>
    %cst_27 = arith.constant dense<0.000000e+00> : vector<8x8xf32>
    %78 = tpu.matmul %75, %77, %cst_27 {dimension_numbers = #tpu.dot_dimension_numbers<[1], [0], [0], [1], [0, 0, 1, 1], [], []>} : vector<8x8xf32>, vector<8x8xf32>, vector<8x8xf32> -> vector<8x8xf32>
    %cst_28 = arith.constant 0.353553385 : f32
    %79 = vector.broadcast %cst_28 : f32 to vector<8x8xf32>
    %80 = arith.mulf %78, %79 : vector<8x8xf32>
    %cst_29 = arith.constant dense<0xFF800000> : vector<8xf32>
    %81 = vector.multi_reduction <maximumf>, %80, %cst_29 [1] : vector<8x8xf32> to vector<8xf32>
    %82 = vector.shape_cast %81 : vector<8xf32> to vector<8x1xf32>
    %83 = vector.broadcast %82 : vector<8x1xf32> to vector<8x8xf32>
    %84 = arith.subf %80, %83 : vector<8x8xf32>
    %85 = math.exp %84 : vector<8x8xf32>
    %cst_30 = arith.constant dense<0.000000e+00> : vector<8xf32>
    %86 = vector.multi_reduction <add>, %85, %cst_30 [1] : vector<8x8xf32> to vector<8xf32>
    %87 = vector.shape_cast %86 : vector<8xf32> to vector<8x1xf32>
    %88 = tpu.reciprocal %87 {approx = true} : vector<8x1xf32> -> vector<8x1xf32>
    %89 = vector.broadcast %88 : vector<8x1xf32> to vector<8x8xf32>
    %90 = arith.mulf %85, %89 : vector<8x8xf32>
    %91 = vector.extract_strided_slice %36 {offsets = [0, 16], sizes = [8, 8], strides = [1, 1]} : vector<8x32xf32> to vector<8x8xf32>
    %cst_31 = arith.constant dense<0.000000e+00> : vector<8x8xf32>
    %92 = tpu.matmul %90, %91, %cst_31 {dimension_numbers = #tpu.dot_dimension_numbers<[1], [0], [0], [1], [0, 0, 1, 1], [], []>} : vector<8x8xf32>, vector<8x8xf32>, vector<8x8xf32> -> vector<8x8xf32>
    %c0_32 = arith.constant 0 : index
    %c16 = arith.constant 16 : index
    %93 = vector.load %arg11[%c0_32, %c16] : memref<16x32xf32, #tpu.memory_space<vmem>>, vector<8x8xf32>
    tpu.vector_store %arg11[%c0_32, %c16], %92 {strides = array<i32>} : memref<16x32xf32, #tpu.memory_space<vmem>>, vector<8x8xf32>,
    %94 = vector.extract_strided_slice %34 {offsets = [0, 24], sizes = [8, 8], strides = [1, 1]} : vector<8x32xf32> to vector<8x8xf32>
    %95 = vector.extract_strided_slice %35 {offsets = [0, 24], sizes = [8, 8], strides = [1, 1]} : vector<8x32xf32> to vector<8x8xf32>
    %96 = tpu.transpose %95, [1, 0] : vector<8x8xf32> -> vector<8x8xf32>
    %cst_33 = arith.constant dense<0.000000e+00> : vector<8x8xf32>
    %97 = tpu.matmul %94, %96, %cst_33 {dimension_numbers = #tpu.dot_dimension_numbers<[1], [0], [0], [1], [0, 0, 1, 1], [], []>} : vector<8x8xf32>, vector<8x8xf32>, vector<8x8xf32> -> vector<8x8xf32>
    %cst_34 = arith.constant 0.353553385 : f32
    %98 = vector.broadcast %cst_34 : f32 to vector<8x8xf32>
    %99 = arith.mulf %97, %98 : vector<8x8xf32>
    %cst_35 = arith.constant dense<0xFF800000> : vector<8xf32>
    %100 = vector.multi_reduction <maximumf>, %99, %cst_35 [1] : vector<8x8xf32> to vector<8xf32>
    %101 = vector.shape_cast %100 : vector<8xf32> to vector<8x1xf32>
    %102 = vector.broadcast %101 : vector<8x1xf32> to vector<8x8xf32>
    %103 = arith.subf %99, %102 : vector<8x8xf32>
    %104 = math.exp %103 : vector<8x8xf32>
    %cst_36 = arith.constant dense<0.000000e+00> : vector<8xf32>
    %105 = vector.multi_reduction <add>, %104, %cst_36 [1] : vector<8x8xf32> to vector<8xf32>
    %106 = vector.shape_cast %105 : vector<8xf32> to vector<8x1xf32>
    %107 = tpu.reciprocal %106 {approx = true} : vector<8x1xf32> -> vector<8x1xf32>
    %108 = vector.broadcast %107 : vector<8x1xf32> to vector<8x8xf32>
    %109 = arith.mulf %104, %108 : vector<8x8xf32>
    %110 = vector.extract_strided_slice %36 {offsets = [0, 24], sizes = [8, 8], strides = [1, 1]} : vector<8x32xf32> to vector<8x8xf32>
    %cst_37 = arith.constant dense<0.000000e+00> : vector<8x8xf32>
    %111 = tpu.matmul %109, %110, %cst_37 {dimension_numbers = #tpu.dot_dimension_numbers<[1], [0], [0], [1], [0, 0, 1, 1], [], []>} : vector<8x8xf32>, vector<8x8xf32>, vector<8x8xf32> -> vector<8x8xf32>
    %c0_38 = arith.constant 0 : index
    %c24 = arith.constant 24 : index
    %112 = vector.load %arg11[%c0_38, %c24] : memref<16x32xf32, #tpu.memory_space<vmem>>, vector<8x8xf32>
    tpu.vector_store %arg11[%c0_38, %c24], %111 {strides = array<i32>} : memref<16x32xf32, #tpu.memory_space<vmem>>, vector<8x8xf32>,
    %113 = vector.extract_strided_slice %31 {offsets = [8, 0], sizes = [8, 32], strides = [1, 1]} : vector<16x32xf32> to vector<8x32xf32>
    %114 = vector.extract_strided_slice %32 {offsets = [8, 0], sizes = [8, 32], strides = [1, 1]} : vector<16x32xf32> to vector<8x32xf32>
    %115 = vector.extract_strided_slice %33 {offsets = [8, 0], sizes = [8, 32], strides = [1, 1]} : vector<16x32xf32> to vector<8x32xf32>
    %116 = vector.extract_strided_slice %113 {offsets = [0, 0], sizes = [8, 8], strides = [1, 1]} : vector<8x32xf32> to vector<8x8xf32>
    %117 = vector.extract_strided_slice %114 {offsets = [0, 0], sizes = [8, 8], strides = [1, 1]} : vector<8x32xf32> to vector<8x8xf32>
    %118 = tpu.transpose %117, [1, 0] : vector<8x8xf32> -> vector<8x8xf32>
    %cst_39 = arith.constant dense<0.000000e+00> : vector<8x8xf32>
    %119 = tpu.matmul %116, %118, %cst_39 {dimension_numbers = #tpu.dot_dimension_numbers<[1], [0], [0], [1], [0, 0, 1, 1], [], []>} : vector<8x8xf32>, vector<8x8xf32>, vector<8x8xf32> -> vector<8x8xf32>
    %cst_40 = arith.constant 0.353553385 : f32
    %120 = vector.broadcast %cst_40 : f32 to vector<8x8xf32>
    %121 = arith.mulf %119, %120 : vector<8x8xf32>
    %cst_41 = arith.constant dense<0xFF800000> : vector<8xf32>
    %122 = vector.multi_reduction <maximumf>, %121, %cst_41 [1] : vector<8x8xf32> to vector<8xf32>
    %123 = vector.shape_cast %122 : vector<8xf32> to vector<8x1xf32>
    %124 = vector.broadcast %123 : vector<8x1xf32> to vector<8x8xf32>
    %125 = arith.subf %121, %124 : vector<8x8xf32>
    %126 = math.exp %125 : vector<8x8xf32>
    %cst_42 = arith.constant dense<0.000000e+00> : vector<8xf32>
    %127 = vector.multi_reduction <add>, %126, %cst_42 [1] : vector<8x8xf32> to vector<8xf32>
    %128 = vector.shape_cast %127 : vector<8xf32> to vector<8x1xf32>
    %129 = tpu.reciprocal %128 {approx = true} : vector<8x1xf32> -> vector<8x1xf32>
    %130 = vector.broadcast %129 : vector<8x1xf32> to vector<8x8xf32>
    %131 = arith.mulf %126, %130 : vector<8x8xf32>
    %132 = vector.extract_strided_slice %115 {offsets = [0, 0], sizes = [8, 8], strides = [1, 1]} : vector<8x32xf32> to vector<8x8xf32>
    %cst_43 = arith.constant dense<0.000000e+00> : vector<8x8xf32>
    %133 = tpu.matmul %131, %132, %cst_43 {dimension_numbers = #tpu.dot_dimension_numbers<[1], [0], [0], [1], [0, 0, 1, 1], [], []>} : vector<8x8xf32>, vector<8x8xf32>, vector<8x8xf32> -> vector<8x8xf32>
    %c8_44 = arith.constant 8 : index
    %c0_45 = arith.constant 0 : index
    %134 = vector.load %arg11[%c8_44, %c0_45] : memref<16x32xf32, #tpu.memory_space<vmem>>, vector<8x8xf32>
    tpu.vector_store %arg11[%c8_44, %c0_45], %133 {strides = array<i32>} : memref<16x32xf32, #tpu.memory_space<vmem>>, vector<8x8xf32>,
    %135 = vector.extract_strided_slice %113 {offsets = [0, 8], sizes = [8, 8], strides = [1, 1]} : vector<8x32xf32> to vector<8x8xf32>
    %136 = vector.extract_strided_slice %114 {offsets = [0, 8], sizes = [8, 8], strides = [1, 1]} : vector<8x32xf32> to vector<8x8xf32>
    %137 = tpu.transpose %136, [1, 0] : vector<8x8xf32> -> vector<8x8xf32>
    %cst_46 = arith.constant dense<0.000000e+00> : vector<8x8xf32>
    %138 = tpu.matmul %135, %137, %cst_46 {dimension_numbers = #tpu.dot_dimension_numbers<[1], [0], [0], [1], [0, 0, 1, 1], [], []>} : vector<8x8xf32>, vector<8x8xf32>, vector<8x8xf32> -> vector<8x8xf32>
    %cst_47 = arith.constant 0.353553385 : f32
    %139 = vector.broadcast %cst_47 : f32 to vector<8x8xf32>
    %140 = arith.mulf %138, %139 : vector<8x8xf32>
    %cst_48 = arith.constant dense<0xFF800000> : vector<8xf32>
    %141 = vector.multi_reduction <maximumf>, %140, %cst_48 [1] : vector<8x8xf32> to vector<8xf32>
    %142 = vector.shape_cast %141 : vector<8xf32> to vector<8x1xf32>
    %143 = vector.broadcast %142 : vector<8x1xf32> to vector<8x8xf32>
    %144 = arith.subf %140, %143 : vector<8x8xf32>
    %145 = math.exp %144 : vector<8x8xf32>
    %cst_49 = arith.constant dense<0.000000e+00> : vector<8xf32>
    %146 = vector.multi_reduction <add>, %145, %cst_49 [1] : vector<8x8xf32> to vector<8xf32>
    %147 = vector.shape_cast %146 : vector<8xf32> to vector<8x1xf32>
    %148 = tpu.reciprocal %147 {approx = true} : vector<8x1xf32> -> vector<8x1xf32>
    %149 = vector.broadcast %148 : vector<8x1xf32> to vector<8x8xf32>
    %150 = arith.mulf %145, %149 : vector<8x8xf32>
    %151 = vector.extract_strided_slice %115 {offsets = [0, 8], sizes = [8, 8], strides = [1, 1]} : vector<8x32xf32> to vector<8x8xf32>
    %cst_50 = arith.constant dense<0.000000e+00> : vector<8x8xf32>
    %152 = tpu.matmul %150, %151, %cst_50 {dimension_numbers = #tpu.dot_dimension_numbers<[1], [0], [0], [1], [0, 0, 1, 1], [], []>} : vector<8x8xf32>, vector<8x8xf32>, vector<8x8xf32> -> vector<8x8xf32>
    %c8_51 = arith.constant 8 : index
    %c8_52 = arith.constant 8 : index
    %153 = vector.load %arg11[%c8_51, %c8_52] : memref<16x32xf32, #tpu.memory_space<vmem>>, vector<8x8xf32>
    tpu.vector_store %arg11[%c8_51, %c8_52], %152 {strides = array<i32>} : memref<16x32xf32, #tpu.memory_space<vmem>>, vector<8x8xf32>,
    %154 = vector.extract_strided_slice %113 {offsets = [0, 16], sizes = [8, 8], strides = [1, 1]} : vector<8x32xf32> to vector<8x8xf32>
    %155 = vector.extract_strided_slice %114 {offsets = [0, 16], sizes = [8, 8], strides = [1, 1]} : vector<8x32xf32> to vector<8x8xf32>
    %156 = tpu.transpose %155, [1, 0] : vector<8x8xf32> -> vector<8x8xf32>
    %cst_53 = arith.constant dense<0.000000e+00> : vector<8x8xf32>
    %157 = tpu.matmul %154, %156, %cst_53 {dimension_numbers = #tpu.dot_dimension_numbers<[1], [0], [0], [1], [0, 0, 1, 1], [], []>} : vector<8x8xf32>, vector<8x8xf32>, vector<8x8xf32> -> vector<8x8xf32>
    %cst_54 = arith.constant 0.353553385 : f32
    %158 = vector.broadcast %cst_54 : f32 to vector<8x8xf32>
    %159 = arith.mulf %157, %158 : vector<8x8xf32>
    %cst_55 = arith.constant dense<0xFF800000> : vector<8xf32>
    %160 = vector.multi_reduction <maximumf>, %159, %cst_55 [1] : vector<8x8xf32> to vector<8xf32>
    %161 = vector.shape_cast %160 : vector<8xf32> to vector<8x1xf32>
    %162 = vector.broadcast %161 : vector<8x1xf32> to vector<8x8xf32>
    %163 = arith.subf %159, %162 : vector<8x8xf32>
    %164 = math.exp %163 : vector<8x8xf32>
    %cst_56 = arith.constant dense<0.000000e+00> : vector<8xf32>
    %165 = vector.multi_reduction <add>, %164, %cst_56 [1] : vector<8x8xf32> to vector<8xf32>
    %166 = vector.shape_cast %165 : vector<8xf32> to vector<8x1xf32>
    %167 = tpu.reciprocal %166 {approx = true} : vector<8x1xf32> -> vector<8x1xf32>
    %168 = vector.broadcast %167 : vector<8x1xf32> to vector<8x8xf32>
    %169 = arith.mulf %164, %168 : vector<8x8xf32>
    %170 = vector.extract_strided_slice %115 {offsets = [0, 16], sizes = [8, 8], strides = [1, 1]} : vector<8x32xf32> to vector<8x8xf32>
    %cst_57 = arith.constant dense<0.000000e+00> : vector<8x8xf32>
    %171 = tpu.matmul %169, %170, %cst_57 {dimension_numbers = #tpu.dot_dimension_numbers<[1], [0], [0], [1], [0, 0, 1, 1], [], []>} : vector<8x8xf32>, vector<8x8xf32>, vector<8x8xf32> -> vector<8x8xf32>
    %c8_58 = arith.constant 8 : index
    %c16_59 = arith.constant 16 : index
    %172 = vector.load %arg11[%c8_58, %c16_59] : memref<16x32xf32, #tpu.memory_space<vmem>>, vector<8x8xf32>
    tpu.vector_store %arg11[%c8_58, %c16_59], %171 {strides = array<i32>} : memref<16x32xf32, #tpu.memory_space<vmem>>, vector<8x8xf32>,
    %173 = vector.extract_strided_slice %113 {offsets = [0, 24], sizes = [8, 8], strides = [1, 1]} : vector<8x32xf32> to vector<8x8xf32>
    %174 = vector.extract_strided_slice %114 {offsets = [0, 24], sizes = [8, 8], strides = [1, 1]} : vector<8x32xf32> to vector<8x8xf32>
    %175 = tpu.transpose %174, [1, 0] : vector<8x8xf32> -> vector<8x8xf32>
    %cst_60 = arith.constant dense<0.000000e+00> : vector<8x8xf32>
    %176 = tpu.matmul %173, %175, %cst_60 {dimension_numbers = #tpu.dot_dimension_numbers<[1], [0], [0], [1], [0, 0, 1, 1], [], []>} : vector<8x8xf32>, vector<8x8xf32>, vector<8x8xf32> -> vector<8x8xf32>
    %cst_61 = arith.constant 0.353553385 : f32
    %177 = vector.broadcast %cst_61 : f32 to vector<8x8xf32>
    %178 = arith.mulf %176, %177 : vector<8x8xf32>
    %cst_62 = arith.constant dense<0xFF800000> : vector<8xf32>
    %179 = vector.multi_reduction <maximumf>, %178, %cst_62 [1] : vector<8x8xf32> to vector<8xf32>
    %180 = vector.shape_cast %179 : vector<8xf32> to vector<8x1xf32>
    %181 = vector.broadcast %180 : vector<8x1xf32> to vector<8x8xf32>
    %182 = arith.subf %178, %181 : vector<8x8xf32>
    %183 = math.exp %182 : vector<8x8xf32>
    %cst_63 = arith.constant dense<0.000000e+00> : vector<8xf32>
    %184 = vector.multi_reduction <add>, %183, %cst_63 [1] : vector<8x8xf32> to vector<8xf32>
    %185 = vector.shape_cast %184 : vector<8xf32> to vector<8x1xf32>
    %186 = tpu.reciprocal %185 {approx = true} : vector<8x1xf32> -> vector<8x1xf32>
    %187 = vector.broadcast %186 : vector<8x1xf32> to vector<8x8xf32>
    %188 = arith.mulf %183, %187 : vector<8x8xf32>
    %189 = vector.extract_strided_slice %115 {offsets = [0, 24], sizes = [8, 8], strides = [1, 1]} : vector<8x32xf32> to vector<8x8xf32>
    %cst_64 = arith.constant dense<0.000000e+00> : vector<8x8xf32>
    %190 = tpu.matmul %188, %189, %cst_64 {dimension_numbers = #tpu.dot_dimension_numbers<[1], [0], [0], [1], [0, 0, 1, 1], [], []>} : vector<8x8xf32>, vector<8x8xf32>, vector<8x8xf32> -> vector<8x8xf32>
    %c8_65 = arith.constant 8 : index
    %c24_66 = arith.constant 24 : index
    %191 = vector.load %arg11[%c8_65, %c24_66] : memref<16x32xf32, #tpu.memory_space<vmem>>, vector<8x8xf32>
    tpu.vector_store %arg11[%c8_65, %c24_66], %190 {strides = array<i32>} : memref<16x32xf32, #tpu.memory_space<vmem>>, vector<8x8xf32>,
    %c0_67 = arith.constant 0 : index
    %c0_68 = arith.constant 0 : index
    %192 = vector.load %arg11[%c0_67, %c0_68] : memref<16x32xf32, #tpu.memory_space<vmem>>, vector<16x32xf32>
    %193 = tpu.concatenate %52, %71, %90, %109, %131, %150, %169, %188 in 0 : vector<8x8xf32>, vector<8x8xf32>, vector<8x8xf32>, vector<8x8xf32>, vector<8x8xf32>, vector<8x8xf32>, vector<8x8xf32>, vector<8x8xf32> -> vector<64x8xf32>
    %c0_69 = arith.constant 0 : index
    %c0_70 = arith.constant 0 : index
    %c0_71 = arith.constant 0 : index
    %194 = vector.load %arg2[%c0_69, %c0_70, %c0_71] : memref<3x32x32xf32, #tpu.memory_space<vmem>>, vector<1x32x32xf32>
    %195 = vector.shape_cast %194 : vector<1x32x32xf32> to vector<32x32xf32>
    %cst_72 = arith.constant dense<0.000000e+00> : vector<16x32xf32>
    %196 = tpu.matmul %192, %195, %cst_72 {dimension_numbers = #tpu.dot_dimension_numbers<[1], [0], [0], [1], [0, 0, 1, 1], [], []>} : vector<16x32xf32>, vector<32x32xf32>, vector<16x32xf32> -> vector<16x32xf32>
    %197 = arith.addf %0, %196 : vector<16x32xf32>
    %c6 = arith.constant 6 : index
    %c0_73 = arith.constant 0 : index
    %198 = vector.load %arg7[%c6, %c0_73] : memref<13x128xf32, #tpu.memory_space<vmem>>, vector<1x32xf32>
    %199 = vector.broadcast %198 : vector<1x32xf32> to vector<16x32xf32>
    %200 = arith.addf %197, %199 : vector<16x32xf32>
    %c2 = arith.constant 2 : index
    %c0_74 = arith.constant 0 : index
    %201 = vector.load %arg7[%c2, %c0_74] : memref<13x128xf32, #tpu.memory_space<vmem>>, vector<1x32xf32>
    %c3 = arith.constant 3 : index
    %c0_75 = arith.constant 0 : index
    %202 = vector.load %arg7[%c3, %c0_75] : memref<13x128xf32, #tpu.memory_space<vmem>>, vector<1x32xf32>
    %cst_76 = arith.constant dense<0.000000e+00> : vector<16xf32>
    %203 = vector.multi_reduction <add>, %200, %cst_76 [1] : vector<16x32xf32> to vector<16xf32>
    %204 = vector.shape_cast %203 : vector<16xf32> to vector<16x1xf32>
    %cst_77 = arith.constant 3.200000e+01 : f32
    %205 = vector.broadcast %cst_77 : f32 to vector<16x1xf32>
    %206 = arith.divf %204, %205 : vector<16x1xf32>
    %207 = vector.broadcast %206 : vector<16x1xf32> to vector<16x32xf32>
    %208 = arith.subf %200, %207 : vector<16x32xf32>
    %209 = arith.mulf %208, %208 : vector<16x32xf32>
    %cst_78 = arith.constant dense<0.000000e+00> : vector<16xf32>
    %210 = vector.multi_reduction <add>, %209, %cst_78 [1] : vector<16x32xf32> to vector<16xf32>
    %211 = vector.shape_cast %210 : vector<16xf32> to vector<16x1xf32>
    %cst_79 = arith.constant 3.200000e+01 : f32
    %212 = vector.broadcast %cst_79 : f32 to vector<16x1xf32>
    %213 = arith.divf %211, %212 : vector<16x1xf32>
    %214 = vector.broadcast %206 : vector<16x1xf32> to vector<16x32xf32>
    %215 = arith.subf %200, %214 : vector<16x32xf32>
    %cst_80 = arith.constant 9.99999974E-6 : f32
    %216 = vector.broadcast %cst_80 : f32 to vector<16x1xf32>
    %217 = arith.addf %213, %216 : vector<16x1xf32>
    %218 = math.rsqrt %217 : vector<16x1xf32>
    %219 = vector.broadcast %218 : vector<16x1xf32> to vector<16x32xf32>
    %220 = arith.mulf %215, %219 : vector<16x32xf32>
    %221 = vector.broadcast %201 : vector<1x32xf32> to vector<16x32xf32>
    %222 = arith.mulf %220, %221 : vector<16x32xf32>
    %223 = vector.broadcast %202 : vector<1x32xf32> to vector<16x32xf32>
    %224 = arith.addf %222, %223 : vector<16x32xf32>
    %c1_81 = arith.constant 1 : index
    %c0_82 = arith.constant 0 : index
    %c0_83 = arith.constant 0 : index
    %225 = vector.load %arg2[%c1_81, %c0_82, %c0_83] : memref<3x32x32xf32, #tpu.memory_space<vmem>>, vector<1x32x32xf32>
    %226 = vector.shape_cast %225 : vector<1x32x32xf32> to vector<32x32xf32>
    %cst_84 = arith.constant dense<0.000000e+00> : vector<16x32xf32>
    %227 = tpu.matmul %224, %226, %cst_84 {dimension_numbers = #tpu.dot_dimension_numbers<[1], [0], [0], [1], [0, 0, 1, 1], [], []>} : vector<16x32xf32>, vector<32x32xf32>, vector<16x32xf32> -> vector<16x32xf32>
    %c7 = arith.constant 7 : index
    %c0_85 = arith.constant 0 : index
    %228 = vector.load %arg7[%c7, %c0_85] : memref<13x128xf32, #tpu.memory_space<vmem>>, vector<1x32xf32>
    %229 = vector.broadcast %228 : vector<1x32xf32> to vector<16x32xf32>
    %230 = arith.addf %227, %229 : vector<16x32xf32>
    %c0_86 = arith.constant 0 : index
    %c0_87 = arith.constant 0 : index
    %231 = vector.load %arg4[%c0_86, %c0_87] : memref<32x64xf32, #tpu.memory_space<vmem>>, vector<32x64xf32>
    %cst_88 = arith.constant dense<0.000000e+00> : vector<32x64xf32>
    %232 = tpu.matmul %1, %231, %cst_88 {dimension_numbers = #tpu.dot_dimension_numbers<[1], [0], [0], [1], [0, 0, 1, 1], [], []>} : vector<32x32xf32>, vector<32x64xf32>, vector<32x64xf32> -> vector<32x64xf32>
    %c11 = arith.constant 11 : index
    %c0_89 = arith.constant 0 : index
    %233 = vector.load %arg7[%c11, %c0_89] : memref<13x128xf32, #tpu.memory_space<vmem>>, vector<1x64xf32>
    %234 = vector.broadcast %233 : vector<1x64xf32> to vector<32x64xf32>
    %235 = arith.addf %232, %234 : vector<32x64xf32>
    %236 = vector.extract_strided_slice %235 {offsets = [0, 0], sizes = [32, 32], strides = [1, 1]} : vector<32x64xf32> to vector<32x32xf32>
    %237 = vector.extract_strided_slice %235 {offsets = [0, 32], sizes = [32, 32], strides = [1, 1]} : vector<32x64xf32> to vector<32x32xf32>
    %238 = vector.extract_strided_slice %230 {offsets = [0, 0], sizes = [8, 32], strides = [1, 1]} : vector<16x32xf32> to vector<8x32xf32>
    %239 = vector.extract_strided_slice %236 {offsets = [0, 0], sizes = [16, 32], strides = [1, 1]} : vector<32x32xf32> to vector<16x32xf32>
    %240 = vector.extract_strided_slice %237 {offsets = [0, 0], sizes = [16, 32], strides = [1, 1]} : vector<32x32xf32> to vector<16x32xf32>
    %241 = vector.extract_strided_slice %238 {offsets = [0, 0], sizes = [8, 8], strides = [1, 1]} : vector<8x32xf32> to vector<8x8xf32>
    %242 = vector.extract_strided_slice %239 {offsets = [0, 0], sizes = [16, 8], strides = [1, 1]} : vector<16x32xf32> to vector<16x8xf32>
    %243 = tpu.transpose %242, [1, 0] : vector<16x8xf32> -> vector<8x16xf32>
    %cst_90 = arith.constant dense<0.000000e+00> : vector<8x16xf32>
    %244 = tpu.matmul %241, %243, %cst_90 {dimension_numbers = #tpu.dot_dimension_numbers<[1], [0], [0], [1], [0, 0, 1, 1], [], []>} : vector<8x8xf32>, vector<8x16xf32>, vector<8x16xf32> -> vector<8x16xf32>
    %cst_91 = arith.constant 0.353553385 : f32
    %245 = vector.broadcast %cst_91 : f32 to vector<8x16xf32>
    %246 = arith.mulf %244, %245 : vector<8x16xf32>
    %cst_92 = arith.constant dense<0xFF800000> : vector<8xf32>
    %247 = vector.multi_reduction <maximumf>, %246, %cst_92 [1] : vector<8x16xf32> to vector<8xf32>
    %248 = vector.shape_cast %247 : vector<8xf32> to vector<8x1xf32>
    %249 = vector.broadcast %248 : vector<8x1xf32> to vector<8x16xf32>
    %250 = arith.subf %246, %249 : vector<8x16xf32>
    %251 = math.exp %250 : vector<8x16xf32>
    %cst_93 = arith.constant dense<0.000000e+00> : vector<8xf32>
    %252 = vector.multi_reduction <add>, %251, %cst_93 [1] : vector<8x16xf32> to vector<8xf32>
    %253 = vector.shape_cast %252 : vector<8xf32> to vector<8x1xf32>
    %254 = tpu.reciprocal %253 {approx = true} : vector<8x1xf32> -> vector<8x1xf32>
    %255 = vector.broadcast %254 : vector<8x1xf32> to vector<8x16xf32>
    %256 = arith.mulf %251, %255 : vector<8x16xf32>
    %257 = vector.extract_strided_slice %240 {offsets = [0, 0], sizes = [16, 8], strides = [1, 1]} : vector<16x32xf32> to vector<16x8xf32>
    %cst_94 = arith.constant dense<0.000000e+00> : vector<8x8xf32>
    %258 = tpu.matmul %256, %257, %cst_94 {dimension_numbers = #tpu.dot_dimension_numbers<[1], [0], [0], [1], [0, 0, 1, 1], [], []>} : vector<8x16xf32>, vector<16x8xf32>, vector<8x8xf32> -> vector<8x8xf32>
    %c0_95 = arith.constant 0 : index
    %c0_96 = arith.constant 0 : index
    %259 = vector.load %arg11[%c0_95, %c0_96] : memref<16x32xf32, #tpu.memory_space<vmem>>, vector<8x8xf32>
    tpu.vector_store %arg11[%c0_95, %c0_96], %258 {strides = array<i32>} : memref<16x32xf32, #tpu.memory_space<vmem>>, vector<8x8xf32>,
    %260 = vector.extract_strided_slice %238 {offsets = [0, 8], sizes = [8, 8], strides = [1, 1]} : vector<8x32xf32> to vector<8x8xf32>
    %261 = vector.extract_strided_slice %239 {offsets = [0, 8], sizes = [16, 8], strides = [1, 1]} : vector<16x32xf32> to vector<16x8xf32>
    %262 = tpu.transpose %261, [1, 0] : vector<16x8xf32> -> vector<8x16xf32>
    %cst_97 = arith.constant dense<0.000000e+00> : vector<8x16xf32>
    %263 = tpu.matmul %260, %262, %cst_97 {dimension_numbers = #tpu.dot_dimension_numbers<[1], [0], [0], [1], [0, 0, 1, 1], [], []>} : vector<8x8xf32>, vector<8x16xf32>, vector<8x16xf32> -> vector<8x16xf32>
    %cst_98 = arith.constant 0.353553385 : f32
    %264 = vector.broadcast %cst_98 : f32 to vector<8x16xf32>
    %265 = arith.mulf %263, %264 : vector<8x16xf32>
    %cst_99 = arith.constant dense<0xFF800000> : vector<8xf32>
    %266 = vector.multi_reduction <maximumf>, %265, %cst_99 [1] : vector<8x16xf32> to vector<8xf32>
    %267 = vector.shape_cast %266 : vector<8xf32> to vector<8x1xf32>
    %268 = vector.broadcast %267 : vector<8x1xf32> to vector<8x16xf32>
    %269 = arith.subf %265, %268 : vector<8x16xf32>
    %270 = math.exp %269 : vector<8x16xf32>
    %cst_100 = arith.constant dense<0.000000e+00> : vector<8xf32>
    %271 = vector.multi_reduction <add>, %270, %cst_100 [1] : vector<8x16xf32> to vector<8xf32>
    %272 = vector.shape_cast %271 : vector<8xf32> to vector<8x1xf32>
    %273 = tpu.reciprocal %272 {approx = true} : vector<8x1xf32> -> vector<8x1xf32>
    %274 = vector.broadcast %273 : vector<8x1xf32> to vector<8x16xf32>
    %275 = arith.mulf %270, %274 : vector<8x16xf32>
    %276 = vector.extract_strided_slice %240 {offsets = [0, 8], sizes = [16, 8], strides = [1, 1]} : vector<16x32xf32> to vector<16x8xf32>
    %cst_101 = arith.constant dense<0.000000e+00> : vector<8x8xf32>
    %277 = tpu.matmul %275, %276, %cst_101 {dimension_numbers = #tpu.dot_dimension_numbers<[1], [0], [0], [1], [0, 0, 1, 1], [], []>} : vector<8x16xf32>, vector<16x8xf32>, vector<8x8xf32> -> vector<8x8xf32>
    %c0_102 = arith.constant 0 : index
    %c8_103 = arith.constant 8 : index
    %278 = vector.load %arg11[%c0_102, %c8_103] : memref<16x32xf32, #tpu.memory_space<vmem>>, vector<8x8xf32>
    tpu.vector_store %arg11[%c0_102, %c8_103], %277 {strides = array<i32>} : memref<16x32xf32, #tpu.memory_space<vmem>>, vector<8x8xf32>,
    %279 = vector.extract_strided_slice %238 {offsets = [0, 16], sizes = [8, 8], strides = [1, 1]} : vector<8x32xf32> to vector<8x8xf32>
    %280 = vector.extract_strided_slice %239 {offsets = [0, 16], sizes = [16, 8], strides = [1, 1]} : vector<16x32xf32> to vector<16x8xf32>
    %281 = tpu.transpose %280, [1, 0] : vector<16x8xf32> -> vector<8x16xf32>
    %cst_104 = arith.constant dense<0.000000e+00> : vector<8x16xf32>
    %282 = tpu.matmul %279, %281, %cst_104 {dimension_numbers = #tpu.dot_dimension_numbers<[1], [0], [0], [1], [0, 0, 1, 1], [], []>} : vector<8x8xf32>, vector<8x16xf32>, vector<8x16xf32> -> vector<8x16xf32>
    %cst_105 = arith.constant 0.353553385 : f32
    %283 = vector.broadcast %cst_105 : f32 to vector<8x16xf32>
    %284 = arith.mulf %282, %283 : vector<8x16xf32>
    %cst_106 = arith.constant dense<0xFF800000> : vector<8xf32>
    %285 = vector.multi_reduction <maximumf>, %284, %cst_106 [1] : vector<8x16xf32> to vector<8xf32>
    %286 = vector.shape_cast %285 : vector<8xf32> to vector<8x1xf32>
    %287 = vector.broadcast %286 : vector<8x1xf32> to vector<8x16xf32>
    %288 = arith.subf %284, %287 : vector<8x16xf32>
    %289 = math.exp %288 : vector<8x16xf32>
    %cst_107 = arith.constant dense<0.000000e+00> : vector<8xf32>
    %290 = vector.multi_reduction <add>, %289, %cst_107 [1] : vector<8x16xf32> to vector<8xf32>
    %291 = vector.shape_cast %290 : vector<8xf32> to vector<8x1xf32>
    %292 = tpu.reciprocal %291 {approx = true} : vector<8x1xf32> -> vector<8x1xf32>
    %293 = vector.broadcast %292 : vector<8x1xf32> to vector<8x16xf32>
    %294 = arith.mulf %289, %293 : vector<8x16xf32>
    %295 = vector.extract_strided_slice %240 {offsets = [0, 16], sizes = [16, 8], strides = [1, 1]} : vector<16x32xf32> to vector<16x8xf32>
    %cst_108 = arith.constant dense<0.000000e+00> : vector<8x8xf32>
    %296 = tpu.matmul %294, %295, %cst_108 {dimension_numbers = #tpu.dot_dimension_numbers<[1], [0], [0], [1], [0, 0, 1, 1], [], []>} : vector<8x16xf32>, vector<16x8xf32>, vector<8x8xf32> -> vector<8x8xf32>
    %c0_109 = arith.constant 0 : index
    %c16_110 = arith.constant 16 : index
    %297 = vector.load %arg11[%c0_109, %c16_110] : memref<16x32xf32, #tpu.memory_space<vmem>>, vector<8x8xf32>
    tpu.vector_store %arg11[%c0_109, %c16_110], %296 {strides = array<i32>} : memref<16x32xf32, #tpu.memory_space<vmem>>, vector<8x8xf32>,
    %298 = vector.extract_strided_slice %238 {offsets = [0, 24], sizes = [8, 8], strides = [1, 1]} : vector<8x32xf32> to vector<8x8xf32>
    %299 = vector.extract_strided_slice %239 {offsets = [0, 24], sizes = [16, 8], strides = [1, 1]} : vector<16x32xf32> to vector<16x8xf32>
    %300 = tpu.transpose %299, [1, 0] : vector<16x8xf32> -> vector<8x16xf32>
    %cst_111 = arith.constant dense<0.000000e+00> : vector<8x16xf32>
    %301 = tpu.matmul %298, %300, %cst_111 {dimension_numbers = #tpu.dot_dimension_numbers<[1], [0], [0], [1], [0, 0, 1, 1], [], []>} : vector<8x8xf32>, vector<8x16xf32>, vector<8x16xf32> -> vector<8x16xf32>
    %cst_112 = arith.constant 0.353553385 : f32
    %302 = vector.broadcast %cst_112 : f32 to vector<8x16xf32>
    %303 = arith.mulf %301, %302 : vector<8x16xf32>
    %cst_113 = arith.constant dense<0xFF800000> : vector<8xf32>
    %304 = vector.multi_reduction <maximumf>, %303, %cst_113 [1] : vector<8x16xf32> to vector<8xf32>
    %305 = vector.shape_cast %304 : vector<8xf32> to vector<8x1xf32>
    %306 = vector.broadcast %305 : vector<8x1xf32> to vector<8x16xf32>
    %307 = arith.subf %303, %306 : vector<8x16xf32>
    %308 = math.exp %307 : vector<8x16xf32>
    %cst_114 = arith.constant dense<0.000000e+00> : vector<8xf32>
    %309 = vector.multi_reduction <add>, %308, %cst_114 [1] : vector<8x16xf32> to vector<8xf32>
    %310 = vector.shape_cast %309 : vector<8xf32> to vector<8x1xf32>
    %311 = tpu.reciprocal %310 {approx = true} : vector<8x1xf32> -> vector<8x1xf32>
    %312 = vector.broadcast %311 : vector<8x1xf32> to vector<8x16xf32>
    %313 = arith.mulf %308, %312 : vector<8x16xf32>
    %314 = vector.extract_strided_slice %240 {offsets = [0, 24], sizes = [16, 8], strides = [1, 1]} : vector<16x32xf32> to vector<16x8xf32>
    %cst_115 = arith.constant dense<0.000000e+00> : vector<8x8xf32>
    %315 = tpu.matmul %313, %314, %cst_115 {dimension_numbers = #tpu.dot_dimension_numbers<[1], [0], [0], [1], [0, 0, 1, 1], [], []>} : vector<8x16xf32>, vector<16x8xf32>, vector<8x8xf32> -> vector<8x8xf32>
    %c0_116 = arith.constant 0 : index
    %c24_117 = arith.constant 24 : index
    %316 = vector.load %arg11[%c0_116, %c24_117] : memref<16x32xf32, #tpu.memory_space<vmem>>, vector<8x8xf32>
    tpu.vector_store %arg11[%c0_116, %c24_117], %315 {strides = array<i32>} : memref<16x32xf32, #tpu.memory_space<vmem>>, vector<8x8xf32>,
    %317 = vector.extract_strided_slice %230 {offsets = [8, 0], sizes = [8, 32], strides = [1, 1]} : vector<16x32xf32> to vector<8x32xf32>
    %318 = vector.extract_strided_slice %236 {offsets = [16, 0], sizes = [16, 32], strides = [1, 1]} : vector<32x32xf32> to vector<16x32xf32>
    %319 = vector.extract_strided_slice %237 {offsets = [16, 0], sizes = [16, 32], strides = [1, 1]} : vector<32x32xf32> to vector<16x32xf32>
    %320 = vector.extract_strided_slice %317 {offsets = [0, 0], sizes = [8, 8], strides = [1, 1]} : vector<8x32xf32> to vector<8x8xf32>
    %321 = vector.extract_strided_slice %318 {offsets = [0, 0], sizes = [16, 8], strides = [1, 1]} : vector<16x32xf32> to vector<16x8xf32>
    %322 = tpu.transpose %321, [1, 0] : vector<16x8xf32> -> vector<8x16xf32>
    %cst_118 = arith.constant dense<0.000000e+00> : vector<8x16xf32>
    %323 = tpu.matmul %320, %322, %cst_118 {dimension_numbers = #tpu.dot_dimension_numbers<[1], [0], [0], [1], [0, 0, 1, 1], [], []>} : vector<8x8xf32>, vector<8x16xf32>, vector<8x16xf32> -> vector<8x16xf32>
    %cst_119 = arith.constant 0.353553385 : f32
    %324 = vector.broadcast %cst_119 : f32 to vector<8x16xf32>
    %325 = arith.mulf %323, %324 : vector<8x16xf32>
    %cst_120 = arith.constant dense<0xFF800000> : vector<8xf32>
    %326 = vector.multi_reduction <maximumf>, %325, %cst_120 [1] : vector<8x16xf32> to vector<8xf32>
    %327 = vector.shape_cast %326 : vector<8xf32> to vector<8x1xf32>
    %328 = vector.broadcast %327 : vector<8x1xf32> to vector<8x16xf32>
    %329 = arith.subf %325, %328 : vector<8x16xf32>
    %330 = math.exp %329 : vector<8x16xf32>
    %cst_121 = arith.constant dense<0.000000e+00> : vector<8xf32>
    %331 = vector.multi_reduction <add>, %330, %cst_121 [1] : vector<8x16xf32> to vector<8xf32>
    %332 = vector.shape_cast %331 : vector<8xf32> to vector<8x1xf32>
    %333 = tpu.reciprocal %332 {approx = true} : vector<8x1xf32> -> vector<8x1xf32>
    %334 = vector.broadcast %333 : vector<8x1xf32> to vector<8x16xf32>
    %335 = arith.mulf %330, %334 : vector<8x16xf32>
    %336 = vector.extract_strided_slice %319 {offsets = [0, 0], sizes = [16, 8], strides = [1, 1]} : vector<16x32xf32> to vector<16x8xf32>
    %cst_122 = arith.constant dense<0.000000e+00> : vector<8x8xf32>
    %337 = tpu.matmul %335, %336, %cst_122 {dimension_numbers = #tpu.dot_dimension_numbers<[1], [0], [0], [1], [0, 0, 1, 1], [], []>} : vector<8x16xf32>, vector<16x8xf32>, vector<8x8xf32> -> vector<8x8xf32>
    %c8_123 = arith.constant 8 : index
    %c0_124 = arith.constant 0 : index
    %338 = vector.load %arg11[%c8_123, %c0_124] : memref<16x32xf32, #tpu.memory_space<vmem>>, vector<8x8xf32>
    tpu.vector_store %arg11[%c8_123, %c0_124], %337 {strides = array<i32>} : memref<16x32xf32, #tpu.memory_space<vmem>>, vector<8x8xf32>,
    %339 = vector.extract_strided_slice %317 {offsets = [0, 8], sizes = [8, 8], strides = [1, 1]} : vector<8x32xf32> to vector<8x8xf32>
    %340 = vector.extract_strided_slice %318 {offsets = [0, 8], sizes = [16, 8], strides = [1, 1]} : vector<16x32xf32> to vector<16x8xf32>
    %341 = tpu.transpose %340, [1, 0] : vector<16x8xf32> -> vector<8x16xf32>
    %cst_125 = arith.constant dense<0.000000e+00> : vector<8x16xf32>
    %342 = tpu.matmul %339, %341, %cst_125 {dimension_numbers = #tpu.dot_dimension_numbers<[1], [0], [0], [1], [0, 0, 1, 1], [], []>} : vector<8x8xf32>, vector<8x16xf32>, vector<8x16xf32> -> vector<8x16xf32>
    %cst_126 = arith.constant 0.353553385 : f32
    %343 = vector.broadcast %cst_126 : f32 to vector<8x16xf32>
    %344 = arith.mulf %342, %343 : vector<8x16xf32>
    %cst_127 = arith.constant dense<0xFF800000> : vector<8xf32>
    %345 = vector.multi_reduction <maximumf>, %344, %cst_127 [1] : vector<8x16xf32> to vector<8xf32>
    %346 = vector.shape_cast %345 : vector<8xf32> to vector<8x1xf32>
    %347 = vector.broadcast %346 : vector<8x1xf32> to vector<8x16xf32>
    %348 = arith.subf %344, %347 : vector<8x16xf32>
    %349 = math.exp %348 : vector<8x16xf32>
    %cst_128 = arith.constant dense<0.000000e+00> : vector<8xf32>
    %350 = vector.multi_reduction <add>, %349, %cst_128 [1] : vector<8x16xf32> to vector<8xf32>
    %351 = vector.shape_cast %350 : vector<8xf32> to vector<8x1xf32>
    %352 = tpu.reciprocal %351 {approx = true} : vector<8x1xf32> -> vector<8x1xf32>
    %353 = vector.broadcast %352 : vector<8x1xf32> to vector<8x16xf32>
    %354 = arith.mulf %349, %353 : vector<8x16xf32>
    %355 = vector.extract_strided_slice %319 {offsets = [0, 8], sizes = [16, 8], strides = [1, 1]} : vector<16x32xf32> to vector<16x8xf32>
    %cst_129 = arith.constant dense<0.000000e+00> : vector<8x8xf32>
    %356 = tpu.matmul %354, %355, %cst_129 {dimension_numbers = #tpu.dot_dimension_numbers<[1], [0], [0], [1], [0, 0, 1, 1], [], []>} : vector<8x16xf32>, vector<16x8xf32>, vector<8x8xf32> -> vector<8x8xf32>
    %c8_130 = arith.constant 8 : index
    %c8_131 = arith.constant 8 : index
    %357 = vector.load %arg11[%c8_130, %c8_131] : memref<16x32xf32, #tpu.memory_space<vmem>>, vector<8x8xf32>
    tpu.vector_store %arg11[%c8_130, %c8_131], %356 {strides = array<i32>} : memref<16x32xf32, #tpu.memory_space<vmem>>, vector<8x8xf32>,
    %358 = vector.extract_strided_slice %317 {offsets = [0, 16], sizes = [8, 8], strides = [1, 1]} : vector<8x32xf32> to vector<8x8xf32>
    %359 = vector.extract_strided_slice %318 {offsets = [0, 16], sizes = [16, 8], strides = [1, 1]} : vector<16x32xf32> to vector<16x8xf32>
    %360 = tpu.transpose %359, [1, 0] : vector<16x8xf32> -> vector<8x16xf32>
    %cst_132 = arith.constant dense<0.000000e+00> : vector<8x16xf32>
    %361 = tpu.matmul %358, %360, %cst_132 {dimension_numbers = #tpu.dot_dimension_numbers<[1], [0], [0], [1], [0, 0, 1, 1], [], []>} : vector<8x8xf32>, vector<8x16xf32>, vector<8x16xf32> -> vector<8x16xf32>
    %cst_133 = arith.constant 0.353553385 : f32
    %362 = vector.broadcast %cst_133 : f32 to vector<8x16xf32>
    %363 = arith.mulf %361, %362 : vector<8x16xf32>
    %cst_134 = arith.constant dense<0xFF800000> : vector<8xf32>
    %364 = vector.multi_reduction <maximumf>, %363, %cst_134 [1] : vector<8x16xf32> to vector<8xf32>
    %365 = vector.shape_cast %364 : vector<8xf32> to vector<8x1xf32>
    %366 = vector.broadcast %365 : vector<8x1xf32> to vector<8x16xf32>
    %367 = arith.subf %363, %366 : vector<8x16xf32>
    %368 = math.exp %367 : vector<8x16xf32>
    %cst_135 = arith.constant dense<0.000000e+00> : vector<8xf32>
    %369 = vector.multi_reduction <add>, %368, %cst_135 [1] : vector<8x16xf32> to vector<8xf32>
    %370 = vector.shape_cast %369 : vector<8xf32> to vector<8x1xf32>
    %371 = tpu.reciprocal %370 {approx = true} : vector<8x1xf32> -> vector<8x1xf32>
    %372 = vector.broadcast %371 : vector<8x1xf32> to vector<8x16xf32>
    %373 = arith.mulf %368, %372 : vector<8x16xf32>
    %374 = vector.extract_strided_slice %319 {offsets = [0, 16], sizes = [16, 8], strides = [1, 1]} : vector<16x32xf32> to vector<16x8xf32>
    %cst_136 = arith.constant dense<0.000000e+00> : vector<8x8xf32>
    %375 = tpu.matmul %373, %374, %cst_136 {dimension_numbers = #tpu.dot_dimension_numbers<[1], [0], [0], [1], [0, 0, 1, 1], [], []>} : vector<8x16xf32>, vector<16x8xf32>, vector<8x8xf32> -> vector<8x8xf32>
    %c8_137 = arith.constant 8 : index
    %c16_138 = arith.constant 16 : index
    %376 = vector.load %arg11[%c8_137, %c16_138] : memref<16x32xf32, #tpu.memory_space<vmem>>, vector<8x8xf32>
    tpu.vector_store %arg11[%c8_137, %c16_138], %375 {strides = array<i32>} : memref<16x32xf32, #tpu.memory_space<vmem>>, vector<8x8xf32>,
    %377 = vector.extract_strided_slice %317 {offsets = [0, 24], sizes = [8, 8], strides = [1, 1]} : vector<8x32xf32> to vector<8x8xf32>
    %378 = vector.extract_strided_slice %318 {offsets = [0, 24], sizes = [16, 8], strides = [1, 1]} : vector<16x32xf32> to vector<16x8xf32>
    %379 = tpu.transpose %378, [1, 0] : vector<16x8xf32> -> vector<8x16xf32>
    %cst_139 = arith.constant dense<0.000000e+00> : vector<8x16xf32>
    %380 = tpu.matmul %377, %379, %cst_139 {dimension_numbers = #tpu.dot_dimension_numbers<[1], [0], [0], [1], [0, 0, 1, 1], [], []>} : vector<8x8xf32>, vector<8x16xf32>, vector<8x16xf32> -> vector<8x16xf32>
    %cst_140 = arith.constant 0.353553385 : f32
    %381 = vector.broadcast %cst_140 : f32 to vector<8x16xf32>
    %382 = arith.mulf %380, %381 : vector<8x16xf32>
    %cst_141 = arith.constant dense<0xFF800000> : vector<8xf32>
    %383 = vector.multi_reduction <maximumf>, %382, %cst_141 [1] : vector<8x16xf32> to vector<8xf32>
    %384 = vector.shape_cast %383 : vector<8xf32> to vector<8x1xf32>
    %385 = vector.broadcast %384 : vector<8x1xf32> to vector<8x16xf32>
    %386 = arith.subf %382, %385 : vector<8x16xf32>
    %387 = math.exp %386 : vector<8x16xf32>
    %cst_142 = arith.constant dense<0.000000e+00> : vector<8xf32>
    %388 = vector.multi_reduction <add>, %387, %cst_142 [1] : vector<8x16xf32> to vector<8xf32>
    %389 = vector.shape_cast %388 : vector<8xf32> to vector<8x1xf32>
    %390 = tpu.reciprocal %389 {approx = true} : vector<8x1xf32> -> vector<8x1xf32>
    %391 = vector.broadcast %390 : vector<8x1xf32> to vector<8x16xf32>
    %392 = arith.mulf %387, %391 : vector<8x16xf32>
    %393 = vector.extract_strided_slice %319 {offsets = [0, 24], sizes = [16, 8], strides = [1, 1]} : vector<16x32xf32> to vector<16x8xf32>
    %cst_143 = arith.constant dense<0.000000e+00> : vector<8x8xf32>
    %394 = tpu.matmul %392, %393, %cst_143 {dimension_numbers = #tpu.dot_dimension_numbers<[1], [0], [0], [1], [0, 0, 1, 1], [], []>} : vector<8x16xf32>, vector<16x8xf32>, vector<8x8xf32> -> vector<8x8xf32>
    %c8_144 = arith.constant 8 : index
    %c24_145 = arith.constant 24 : index
    %395 = vector.load %arg11[%c8_144, %c24_145] : memref<16x32xf32, #tpu.memory_space<vmem>>, vector<8x8xf32>
    tpu.vector_store %arg11[%c8_144, %c24_145], %394 {strides = array<i32>} : memref<16x32xf32, #tpu.memory_space<vmem>>, vector<8x8xf32>,
    %c0_146 = arith.constant 0 : index
    %c0_147 = arith.constant 0 : index
    %396 = vector.load %arg11[%c0_146, %c0_147] : memref<16x32xf32, #tpu.memory_space<vmem>>, vector<16x32xf32>
    %397 = tpu.concatenate %256, %275, %294, %313, %335, %354, %373, %392 in 0 : vector<8x16xf32>, vector<8x16xf32>, vector<8x16xf32>, vector<8x16xf32>, vector<8x16xf32>, vector<8x16xf32>, vector<8x16xf32>, vector<8x16xf32> -> vector<64x16xf32>
    %c2_148 = arith.constant 2 : index
    %c0_149 = arith.constant 0 : index
    %c0_150 = arith.constant 0 : index
    %398 = vector.load %arg2[%c2_148, %c0_149, %c0_150] : memref<3x32x32xf32, #tpu.memory_space<vmem>>, vector<1x32x32xf32>
    %399 = vector.shape_cast %398 : vector<1x32x32xf32> to vector<32x32xf32>
    %cst_151 = arith.constant dense<0.000000e+00> : vector<16x32xf32>
    %400 = tpu.matmul %396, %399, %cst_151 {dimension_numbers = #tpu.dot_dimension_numbers<[1], [0], [0], [1], [0, 0, 1, 1], [], []>} : vector<16x32xf32>, vector<32x32xf32>, vector<16x32xf32> -> vector<16x32xf32>
    %401 = arith.addf %200, %400 : vector<16x32xf32>
    %c8_152 = arith.constant 8 : index
    %c0_153 = arith.constant 0 : index
    %402 = vector.load %arg7[%c8_152, %c0_153] : memref<13x128xf32, #tpu.memory_space<vmem>>, vector<1x32xf32>
    %403 = vector.broadcast %402 : vector<1x32xf32> to vector<16x32xf32>
    %404 = arith.addf %401, %403 : vector<16x32xf32>
    %c4 = arith.constant 4 : index
    %c0_154 = arith.constant 0 : index
    %405 = vector.load %arg7[%c4, %c0_154] : memref<13x128xf32, #tpu.memory_space<vmem>>, vector<1x32xf32>
    %c5 = arith.constant 5 : index
    %c0_155 = arith.constant 0 : index
    %406 = vector.load %arg7[%c5, %c0_155] : memref<13x128xf32, #tpu.memory_space<vmem>>, vector<1x32xf32>
    %cst_156 = arith.constant dense<0.000000e+00> : vector<16xf32>
    %407 = vector.multi_reduction <add>, %404, %cst_156 [1] : vector<16x32xf32> to vector<16xf32>
    %408 = vector.shape_cast %407 : vector<16xf32> to vector<16x1xf32>
    %cst_157 = arith.constant 3.200000e+01 : f32
    %409 = vector.broadcast %cst_157 : f32 to vector<16x1xf32>
    %410 = arith.divf %408, %409 : vector<16x1xf32>
    %411 = vector.broadcast %410 : vector<16x1xf32> to vector<16x32xf32>
    %412 = arith.subf %404, %411 : vector<16x32xf32>
    %413 = arith.mulf %412, %412 : vector<16x32xf32>
    %cst_158 = arith.constant dense<0.000000e+00> : vector<16xf32>
    %414 = vector.multi_reduction <add>, %413, %cst_158 [1] : vector<16x32xf32> to vector<16xf32>
    %415 = vector.shape_cast %414 : vector<16xf32> to vector<16x1xf32>
    %cst_159 = arith.constant 3.200000e+01 : f32
    %416 = vector.broadcast %cst_159 : f32 to vector<16x1xf32>
    %417 = arith.divf %415, %416 : vector<16x1xf32>
    %418 = vector.broadcast %410 : vector<16x1xf32> to vector<16x32xf32>
    %419 = arith.subf %404, %418 : vector<16x32xf32>
    %cst_160 = arith.constant 9.99999974E-6 : f32
    %420 = vector.broadcast %cst_160 : f32 to vector<16x1xf32>
    %421 = arith.addf %417, %420 : vector<16x1xf32>
    %422 = math.rsqrt %421 : vector<16x1xf32>
    %423 = vector.broadcast %422 : vector<16x1xf32> to vector<16x32xf32>
    %424 = arith.mulf %419, %423 : vector<16x32xf32>
    %425 = vector.broadcast %405 : vector<1x32xf32> to vector<16x32xf32>
    %426 = arith.mulf %424, %425 : vector<16x32xf32>
    %427 = vector.broadcast %406 : vector<1x32xf32> to vector<16x32xf32>
    %428 = arith.addf %426, %427 : vector<16x32xf32>
    %c0_161 = arith.constant 0 : index
    %c0_162 = arith.constant 0 : index
    %429 = vector.load %arg5[%c0_161, %c0_162] : memref<32x128xf32, #tpu.memory_space<vmem>>, vector<32x128xf32>
    %cst_163 = arith.constant dense<0.000000e+00> : vector<16x128xf32>
    %430 = tpu.matmul %428, %429, %cst_163 {dimension_numbers = #tpu.dot_dimension_numbers<[1], [0], [0], [1], [0, 0, 1, 1], [], []>} : vector<16x32xf32>, vector<32x128xf32>, vector<16x128xf32> -> vector<16x128xf32>
    %c12 = arith.constant 12 : index
    %c0_164 = arith.constant 0 : index
    %431 = vector.load %arg7[%c12, %c0_164] : memref<13x128xf32, #tpu.memory_space<vmem>>, vector<1x128xf32>
    %432 = vector.broadcast %431 : vector<1x128xf32> to vector<16x128xf32>
    %433 = arith.addf %430, %432 : vector<16x128xf32>
    %cst_165 = arith.constant 0.000000e+00 : f32
    %434 = vector.broadcast %cst_165 : f32 to vector<16x128xf32>
    %435 = arith.maximumf %433, %434 : vector<16x128xf32>
    %c0_166 = arith.constant 0 : index
    %c0_167 = arith.constant 0 : index
    %436 = vector.load %arg6[%c0_166, %c0_167] : memref<128x32xf32, #tpu.memory_space<vmem>>, vector<128x32xf32>
    %cst_168 = arith.constant dense<0.000000e+00> : vector<16x32xf32>
    %437 = tpu.matmul %435, %436, %cst_168 {dimension_numbers = #tpu.dot_dimension_numbers<[1], [0], [0], [1], [0, 0, 1, 1], [], []>} : vector<16x128xf32>, vector<128x32xf32>, vector<16x32xf32> -> vector<16x32xf32>
    %438 = arith.addf %404, %437 : vector<16x32xf32>
    %c9 = arith.constant 9 : index
    %c0_169 = arith.constant 0 : index
    %439 = vector.load %arg7[%c9, %c0_169] : memref<13x128xf32, #tpu.memory_space<vmem>>, vector<1x32xf32>
    %440 = vector.broadcast %439 : vector<1x32xf32> to vector<16x32xf32>
    %441 = arith.addf %438, %440 : vector<16x32xf32>
    %c0_170 = arith.constant 0 : index
    %c0_171 = arith.constant 0 : index
    %442 = vector.load %arg8[%c0_170, %c0_171] : memref<16x32xf32, #tpu.memory_space<vmem>>, vector<16x32xf32>
    tpu.vector_store %arg8[%c0_170, %c0_171], %441 {strides = array<i32>} : memref<16x32xf32, #tpu.memory_space<vmem>>, vector<16x32xf32>,
    %c0_172 = arith.constant 0 : index
    %c0_173 = arith.constant 0 : index
    %443 = vector.load %arg9[%c0_172, %c0_173] : memref<64x8xf32, #tpu.memory_space<vmem>>, vector<64x8xf32>
    tpu.vector_store %arg9[%c0_172, %c0_173], %193 {strides = array<i32>} : memref<64x8xf32, #tpu.memory_space<vmem>>, vector<64x8xf32>,
    %c0_174 = arith.constant 0 : index
    %c0_175 = arith.constant 0 : index
    %444 = vector.load %arg10[%c0_174, %c0_175] : memref<64x16xf32, #tpu.memory_space<vmem>>, vector<64x16xf32>
    tpu.vector_store %arg10[%c0_174, %c0_175], %397 {strides = array<i32>} : memref<64x16xf32, #tpu.memory_space<vmem>>, vector<64x16xf32>,
    return
  }
}

</mosaic_0001>

<bundles_post_ra>
// kernel: cross_transformer_block.1
= control target key start
LH: loop header
LB: loop body
LE: loop exit
PB: predicated region body
PF: predicated region fallthrough
CT: control target
= control target key end

     0   :  { %16 = vsyncpa [#allocation4], 0  ;;  %vm42_vm0 = vcmask 261120   ;;  %s5299_s0 = inlined_call_operand.vmem [shape: f32[16,32], index: 0, kind: input, shape index: {}]   ;;  %s5300_s1 = inlined_call_operand.vmem [shape: f32[32,32], index: 1, kind: input, shape index: {}]   ;;  %s5301_s2 = inlined_call_operand.vmem [shape: f32[3,32,32], index: 2, kind: input, shape index: {}]   ;;  %s5302_s3 = inlined_call_operand.vmem [shape: f32[32,96], index: 3, kind: input, shape index: {}]   ;;  %s5303_s4 = inlined_call_operand.vmem [shape: f32[32,64], index: 4, kind: input, shape index: {}]   ;;  %s5304_s5 = inlined_call_operand.vmem [shape: f32[32,128], index: 5, kind: input, shape index: {}]   ;;  %s5305_s6 = inlined_call_operand.vmem [shape: f32[128,32], index: 6, kind: input, shape index: {}]   ;;  %s5306_s7 = inlined_call_operand.vmem [shape: f32[13,128], index: 7, kind: input, shape index: {}]   ;;  %s5307_s8 = inlined_call_operand.hbm [shape: f32[16,32], index: 8, kind: output, shape index: {0}]   ;;  %s5308_s9 = inlined_call_operand.hbm [shape: f32[64,8], index: 9, kind: output, shape index: {1}]   ;;  %s5309_s10 = inlined_call_operand.hbm [shape: f32[64,16], index: 10, kind: output, shape index: {2}]  }
   0x1   :  { %v4647_v0 = vld [vmem:[%s5299_s0] sm:$0xff]  ;;  %v4652_v1 = vld [vmem:[%s5299_s0 + $0x8] sm:$0xff] }
   0x2   :  { %17 = vsyncpa [#allocation6], 0  ;;  %v43_v2 = vsel %vm42_vm0, %v4647_v0, 0.0  ;;  %v46_v3 = vsel %vm42_vm0, %v4652_v1, 0.0  ;;  %v82_v14 = vld [vmem:[%s5302_s3] sm:$0xff]  ;;  %v83_v15 = vld [vmem:[%s5302_s3 + $0x8] sm:$0xff] }
   0x3   :  { %44 = vadd.xlane.f32.xlu0 %v43_v2  ;;  %v84_v16 = vld [vmem:[%s5302_s3 + $0x10] sm:$0xff]  ;;  %v4195_v17 = vpack.c.bf16 %v83_v15, %v82_v14  ;;  %v85_v18 = vld [vmem:[%s5302_s3 + $0x18] sm:$0xff]  ;;  %v3672_v27 = vld [vmem:[%s5306_s7] ss:$0 sm:$0xff]  ;;  %v4568_v36 = vmov 0.0   ;;  %vm4569_vm1 = vmmov 0  }
   0x4   :  { %v4199_v19 = vpack.c.bf16 %v85_v18, %v84_v16  ;;  %v3673_v29 = vld [vmem:[%s5306_s7 + $0x1] ss:$0 sm:$0xff]  ;;  %3920 = vmatprep.subr.mxu0 %v4568_v36  ;;  %3922 = vmatprep.mubr.msk.f32.mxu0 %vm4569_vm1, %v4568_v36  ;;  %v3674_v37 = vld [vmem:[%s5306_s7 + $0xa] ss:$0 sm:$0xff]  ;;  %s4570_s29 = smov 88   ;;  %s4571_s30 = smov 96  }
   0x5   :  { %4196 = vmatprep.subr.bf16.mxu1 %v4195_v17  ;;  %s4572_s11 = smov 120   ;;  %s4573_s12 = smov 112   ;;  %vm175_vm2 = vcmask 64512   ;;  %vm509_vm3 = vcmask 130112   ;;  %vm681_vm4 = vcmask 195712   ;;  %vm853_vm5 = vcmask 261312  }
   0x6   :  { %4198 = vmatpush3.bf16.msra.mxu1 %v4195_v17  ;;  %s4574_s13 = smov 80   ;;  %s4575_s14 = smov 104   ;;  %vm4941_vm6 = vmpackc.low %vm175_vm2, %vm175_vm2  ;;  %vm1947_vm7 = vcmask 130048  }
   0x7   :  { %47 = vadd.xlane.f32.xlu0 %v46_v3  ;;  %4200 = vmatprep.subr.bf16.mxu1 %v4199_v19  ;;  %s4576_s15 = smov 72   ;;  %s4577_s16 = smov 64  }
   0x8   :  { %s4578_s0 = smov 48   ;;  %s4579_s17 = smov 40  }
   0x9   :  { %s4580_s18 = smov 56   ;;  %s4581_s19 = smov 8  }
   0xa   :  { %4202 = vmatpush3.bf16.msra.mxu1 %v4199_v19  ;;  %s4582_s20 = smov 16   ;;  %s4583_s21 = smov 24  }
   0xb   :  { %3910 = vmatprep.subr.mxu1 %v4568_v36 }
  0x90   :  { %v45_v4 = vpop.xlane.xlu0 %44 }
  0x91   :  { %v50_v5 = vmul.f32 0.03125, %v45_v4 }
  0x93   :  { %v52_v6 = vsub.f32 %v4647_v0, %v50_v5 }
  0x94   :  { %v48_v7 = vpop.xlane.xlu0 %47 }
  0x95   :  { %v51_v8 = vmul.f32 0.03125, %v48_v7  ;;  %v54_v9 = vmul.f32 %v52_v6, %v52_v6 }
  0x97   :  { %v53_v10 = vsub.f32 %v4652_v1, %v51_v8  ;;  %v56_v11 = vsel %vm42_vm0, %v54_v9, 0.0 }
  0x98   :  { %57 = vadd.xlane.f32.xlu1 %v56_v11 }
  0x99   :  { %v55_v12 = vmul.f32 %v53_v10, %v53_v10 }
  0x9b   :  { %v59_v13 = vsel %vm42_vm0, %v55_v12, 0.0 }
  0x9c   :  { %60 = vadd.xlane.f32.xlu1 %v59_v13 }
 0x125   :  { %v58_v20 = vpop.xlane.xlu1 %57 }
 0x126   :  { %v62_v21 = vmul.f32 0.03125, %v58_v20 }
 0x128   :  { %v64_v22 = vadd.f32 1e-05, %v62_v21 }
 0x129   :  { %v61_v23 = vpop.xlane.xlu1 %60 }
 0x12a   :  { %4422 = vrsqrt.f32 %v64_v22  ;;  %v63_v24 = vmul.f32 0.03125, %v61_v23 }
 0x12c   :  { %v65_v25 = vadd.f32 1e-05, %v63_v24 }
 0x12e   :  { %4424 = vrsqrt.f32 %v65_v25 }
 0x134   :  { %v4423_v26 = vpop.eup %4422 }
 0x135   :  { %v68_v28 = vmul.f32 %v4423_v26, %v52_v6 }
 0x137   :  { %v74_v30 = vmul.f32 %v3672_v27, %v68_v28 }
 0x138   :  { %v4425_v31 = vpop.eup %4424 }
 0x139   :  { %v69_v32 = vmul.f32 %v4425_v31, %v53_v10  ;;  %v80_v33 = vadd.f32 %v3673_v29, %v74_v30 }
 0x13b   :  { %v75_v34 = vmul.f32 %v3672_v27, %v69_v32  ;;  %3907 = vmatprep.mubr.msk.f32.mxu1 %vm42_vm0, %v80_v33 }
 0x13d   :  { %v81_v35 = vadd.f32 %v3673_v29, %v75_v34 }
 0x13f   :  { %3908 = vmatmul.mubr.msk.f32.vlgmr.msra.gmra.mrb[0].mxu1 %vm42_vm0, %v81_v35 }
 0x140   :  { %3912 = vmatprep.mubr.msk.f32.mxu1 %vm4569_vm1, %v4568_v36 }
 0x212   :  { %v3909_v38 = vpop.f32.mrb[0].mxu1 }
 0x213   :  { %v163_v39 = vpop.f32.mrb[1].mxu1  ;;  %v4705_v41 = vadd.f32 %v3909_v38, %v3674_v37 }
 0x214   :  { %v4691_v40 = vadd.f32 %v3674_v37, %v163_v39 }
 0x216   :  { %341 = vrot.lane.b32.xlu1 %v4691_v40, %s4570_s29  ;;  %173 = vrot.lane.b32.xlu0 %v4691_v40, %s4571_s30 }
 0x21a   :  { %339 = vrot.lane.b32.xlu1 %v4691_v40, %s4572_s11  ;;  %511 = vrot.lane.b32.xlu0 %v4691_v40, %s4573_s12 }
 0x21e   :  { %513 = vrot.lane.b32.xlu1 %v4691_v40, %s4574_s13  ;;  %683 = vrot.lane.b32.xlu0 %v4691_v40, %s4575_s14 }
 0x222   :  { %685 = vrot.lane.b32.xlu1 %v4691_v40, %s4576_s15  ;;  %1023 = vrot.lane.b32.xlu0 %v4705_v41, %s4570_s29 }
 0x226   :  { %856 = vrot.lane.b32.xlu1 %v4705_v41, %s4571_s30  ;;  %1194 = vrot.lane.b32.xlu0 %v4705_v41, %s4574_s13 }
 0x22a   :  { %1021 = vrot.lane.b32.xlu1 %v4705_v41, %s4572_s11  ;;  %1365 = vrot.lane.b32.xlu0 %v4705_v41, %s4576_s15 }
 0x22e   :  { %1192 = vrot.lane.b32.xlu1 %v4705_v41, %s4573_s12 }
 0x232   :  { %1363 = vrot.lane.b32.xlu1 %v4705_v41, %s4575_s14 }
 0x288   :  { %v342_v42 = vpop.permute.xlu1 %341  ;;  %v174_v43 = vpop.permute.xlu0 %173 }
 0x289   :  { %3911 = vmatpush3.xpose.msk.msra.mxu1 %vm175_vm2, %v174_v43  ;;  %3921 = vmatpush3.xpose.msk.msra.mxu0 %vm175_vm2, %v342_v42 }
 0x28a   :  { %3930 = vmatprep.subr.mxu0 %v4568_v36  ;;  %3915 = vmatprep.subr.mxu1 %v4568_v36 }
 0x28c   :  { %v340_v44 = vpop.permute.xlu1 %339  ;;  %3913 = vmatmul.mubr.msk.f32.vlgmr.msra.gmra.mrb[2].mxu1 %vm175_vm2, %v4691_v40  ;;  %v512_v45 = vpop.permute.xlu0 %511 }
 0x28d   :  { %3923 = vmatmul.mubr.msk.f32.vlgmr.msra.gmra.mrb[0].mxu0 %vm175_vm2, %v340_v44  ;;  %3917 = vmatprep.mubr.msk.f32.mxu1 %vm4569_vm1, %v4568_v36 }
 0x28e   :  { %3932 = vmatprep.mubr.msk.f32.mxu0 %vm4569_vm1, %v4568_v36 }
 0x290   :  { %v514_v46 = vpop.permute.xlu1 %513  ;;  %v684_v47 = vpop.permute.xlu0 %683 }
 0x291   :  { %3931 = vmatpush3.xpose.msk.msra.mxu0 %vm175_vm2, %v514_v46 }
 0x292   :  { %3940 = vmatprep.subr.mxu0 %v4568_v36 }
 0x294   :  { %v686_v48 = vpop.permute.xlu1 %685  ;;  %3933 = vmatmul.mubr.msk.f32.vlgmr.msra.gmra.mrb[2].mxu0 %vm175_vm2, %v512_v45  ;;  %v1024_v49 = vpop.permute.xlu0 %1023 }
 0x295   :  { %3941 = vmatpush3.xpose.msk.msra.mxu0 %vm175_vm2, %v686_v48  ;;  %3942 = vmatprep.mubr.msk.f32.mxu0 %vm4569_vm1, %v4568_v36 }
 0x296   :  { %3950 = vmatprep.subr.mxu0 %v4568_v36 }
 0x298   :  { %v857_v50 = vpop.permute.xlu1 %856  ;;  %3943 = vmatmul.mubr.msk.f32.vlgmr.msra.gmra.mrb[4].mxu0 %vm175_vm2, %v684_v47  ;;  %v1195_v52 = vpop.permute.xlu0 %1194 }
 0x299   :  { %3951 = vmatpush3.xpose.msk.msra.mxu0 %vm175_vm2, %v857_v50  ;;  %3952 = vmatprep.mubr.msk.f32.mxu0 %vm4569_vm1, %v4568_v36 }
 0x29a   :  { %3960 = vmatprep.subr.mxu0 %v4568_v36 }
 0x29c   :  { %v1022_v51 = vpop.permute.xlu1 %1021  ;;  %3953 = vmatmul.mubr.msk.f32.vlgmr.msra.gmra.mrb[6].mxu0 %vm175_vm2, %v4705_v41  ;;  %v1366_v54 = vpop.permute.xlu0 %1365 }
 0x29d   :  { %3961 = vmatpush3.xpose.msk.msra.mxu0 %vm175_vm2, %v1024_v49  ;;  %3962 = vmatprep.mubr.msk.f32.mxu0 %vm4569_vm1, %v4568_v36 }
 0x29e   :  { %3970 = vmatprep.subr.mxu0 %v4568_v36 }
 0x2a0   :  { %3963 = vmatmul.mubr.msk.f32.vlgmr.msra.gmra.mrb[8].mxu0 %vm175_vm2, %v1022_v51  ;;  %v1193_v53 = vpop.permute.xlu1 %1192 }
 0x2a1   :  { %3971 = vmatpush3.xpose.msk.msra.mxu0 %vm175_vm2, %v1195_v52  ;;  %3972 = vmatprep.mubr.msk.f32.mxu0 %vm4569_vm1, %v4568_v36 }
 0x2a2   :  { %3980 = vmatprep.subr.mxu0 %v4568_v36 }
 0x2a4   :  { %3973 = vmatmul.mubr.msk.f32.vlgmr.msra.gmra.mrb[10].mxu0 %vm175_vm2, %v1193_v53  ;;  %v1364_v55 = vpop.permute.xlu1 %1363 }
 0x2a5   :  { %3981 = vmatpush3.xpose.msk.msra.mxu0 %vm175_vm2, %v1366_v54  ;;  %3982 = vmatprep.mubr.msk.f32.mxu0 %vm4569_vm1, %v4568_v36 }
 0x2a8   :  { %3983 = vmatmul.mubr.msk.f32.vlgmr.msra.gmra.mrb[12].mxu0 %vm175_vm2, %v1364_v55 }
 0x35f   :  { %v246_v56 = vpop.f32.mrb[2].mxu1 }
 0x360   :  { %v250_v57 = vmul.f32 0.35355338, %v246_v56  ;;  %v3914_v58 = vpop.f32.mrb[3].mxu1  ;;  %v413_v59 = vpop.f32.mrb[0].mxu0 }
 0x361   :  { %v417_v60 = vmul.f32 0.35355338, %v413_v59  ;;  %v3924_v61 = vpop.f32.mrb[1].mxu0 }
 0x362   :  { %v251_v62 = vsel %vm175_vm2, %v250_v57, -inf }
 0x363   :  { %252 = vmax.xlane.f32.xlu0 %v251_v62  ;;  %v418_v63 = vsel %vm175_vm2, %v417_v60, -inf }
 0x364   :  { %419 = vmax.xlane.f32.xlu1 %v418_v63 }
 0x367   :  { %v585_v2 = vpop.f32.mrb[2].mxu0 }
 0x368   :  { %v4764_v3 = vmul.f32 0.35355338, %v585_v2  ;;  %v3934_v4 = vpop.f32.mrb[3].mxu0 }
 0x36a   :  { %v590_v5 = vsel %vm175_vm2, %v4764_v3, -inf }
 0x36b   :  { %591 = vmax.xlane.f32.xlu0 %v590_v5  ;;  %v757_v6 = vpop.f32.mrb[4].mxu0 }
 0x36c   :  { %v761_v7 = vmul.f32 0.35355338, %v757_v6  ;;  %v3944_v8 = vpop.f32.mrb[5].mxu0 }
 0x36e   :  { %v762_v9 = vsel %vm175_vm2, %v761_v7, -inf }
 0x36f   :  { %763 = vmax.xlane.f32.xlu0 %v762_v9  ;;  %v928_v10 = vpop.f32.mrb[6].mxu0 }
 0x370   :  { %v932_v11 = vmul.f32 0.35355338, %v928_v10  ;;  %v3954_v12 = vpop.f32.mrb[7].mxu0 }
 0x372   :  { %v933_v13 = vsel %vm175_vm2, %v932_v11, -inf }
 0x373   :  { %934 = vmax.xlane.f32.xlu0 %v933_v13  ;;  %v1095_v14 = vpop.f32.mrb[8].mxu0 }
 0x374   :  { %v1099_v15 = vmul.f32 0.35355338, %v1095_v14  ;;  %v3964_v16 = vpop.f32.mrb[9].mxu0 }
 0x376   :  { %v1100_v17 = vsel %vm175_vm2, %v1099_v15, -inf }
 0x377   :  { %1101 = vmax.xlane.f32.xlu1 %v1100_v17  ;;  %v1266_v18 = vpop.f32.mrb[10].mxu0 }
 0x378   :  { %v1270_v19 = vmul.f32 0.35355338, %v1266_v18  ;;  %v3974_v20 = vpop.f32.mrb[11].mxu0 }
 0x37a   :  { %v1271_v21 = vsel %vm175_vm2, %v1270_v19, -inf }
 0x37b   :  { %1272 = vmax.xlane.f32.xlu0 %v1271_v21  ;;  %v1437_v22 = vpop.f32.mrb[12].mxu0 }
 0x37c   :  { %v3984_v23 = vpop.f32.mrb[13].mxu0  ;;  %v1441_v24 = vmul.f32 0.35355338, %v1437_v22 }
 0x37e   :  { %v1442_v25 = vsel %vm175_vm2, %v1441_v24, -inf }
 0x388   :  { %262 = vrot.lane.b32.xlu1 %v4691_v40, %s4577_s16 }
 0x3ac   :  { %1443 = vmax.xlane.f32.xlu1 %v1442_v25 }
 0x3bd   :  { %601 = vrot.lane.b32.xlu1 %v4691_v40, %s4578_s0 }
 0x3c1   :  { %773 = vrot.lane.b32.xlu1 %v4691_v40, %s4579_s17 }
 0x3c5   :  { %944 = vrot.lane.b32.xlu1 %v4705_v41, %s4577_s16 }
 0x3f0   :  { %v253_v26 = vpop.xlane.xlu0 %252 }
 0x3f1   :  { %v254_v27 = vsub.f32 %v250_v57, %v253_v26  ;;  %v420_v28 = vpop.xlane.xlu1 %419 }
 0x3f2   :  { %v421_v29 = vsub.f32 %v417_v60, %v420_v28 }
 0x3f3   :  { %v255_v30 = vmul.f32 1.442695, %v254_v27 }
 0x3f4   :  { %v422_v31 = vmul.f32 1.442695, %v421_v29 }
 0x3f5   :  { %4426 = vpow2.f32 %v255_v30 }
 0x3f6   :  { %4428 = vpow2.f32 %v422_v31 }
 0x3f8   :  { %v592_v32 = vpop.xlane.xlu0 %591 }
 0x3f9   :  { %v593_v47 = vsub.f32 %v4764_v3, %v592_v32 }
 0x3fb   :  { %v594_v49 = vmul.f32 1.442695, %v593_v47 }
 0x3fc   :  { %v764_v33 = vpop.xlane.xlu0 %763 }
 0x3fd   :  { %v765_v34 = vsub.f32 %v761_v7, %v764_v33 }
 0x3ff   :  { %v4427_v35 = vpop.eup %4426  ;;  %v766_v37 = vmul.f32 1.442695, %v765_v34 }
 0x400   :  { %v4429_v38 = vpop.eup %4428  ;;  %v257_v39 = vsel %vm175_vm2, %v4427_v35, 0.0  ;;  %v935_v48 = vpop.xlane.xlu0 %934 }
 0x401   :  { %4430 = vpow2.f32 %v766_v37  ;;  %258 = vadd.xlane.f32.xlu0 %v257_v39  ;;  %v424_v42 = vsel %vm175_vm2, %v4429_v38, 0.0  ;;  %v936_v50 = vsub.f32 %v932_v11, %v935_v48  ;;  %v1536_v48 = vld [vmem:[%s5301_s2] sm:$0xff] }
 0x402   :  { %425 = vadd.xlane.f32.xlu1 %v424_v42  ;;  %4432 = vpow2.f32 %v594_v49  ;;  %v1537_v49 = vld [vmem:[%s5301_s2 + $0x8] sm:$0xff] }
 0x403   :  { %v937_v52 = vmul.f32 1.442695, %v936_v50  ;;  %v4203_v50 = vpack.c.bf16 %v1537_v49, %v1536_v48  ;;  %v3704_v48 = vld [vmem:[%s5306_s7 + $0x2] ss:$0 sm:$0xff] }
 0x404   :  { %v1102_v43 = vpop.xlane.xlu1 %1101 }
 0x405   :  { %4434 = vpow2.f32 %v937_v52  ;;  %v1103_v54 = vsub.f32 %v1099_v15, %v1102_v43  ;;  %v1538_v52 = vld [vmem:[%s5301_s2 + $0x10] sm:$0xff] }
 0x407   :  { %v1104_v56 = vmul.f32 1.442695, %v1103_v54 }
 0x408   :  { %v263_v44 = vpop.permute.xlu1 %262  ;;  %v1273_v51 = vpop.xlane.xlu0 %1272 }
 0x409   :  { %3916 = vmatpush3.msra.mxu1 %v263_v44  ;;  %v1274_v53 = vsub.f32 %v1270_v19, %v1273_v51 }
 0x40a   :  { %3925 = vmatprep.subr.mxu1 %v4568_v36 }
 0x40b   :  { %v4782_v45 = vpop.eup %4430  ;;  %v1275_v55 = vmul.f32 1.442695, %v1274_v53  ;;  %v1539_v53 = vld [vmem:[%s5301_s2 + $0x18] sm:$0xff] }
 0x40c   :  { %v768_v46 = vsel %vm175_vm2, %v4782_v45, 0.0  ;;  %v4433_v57 = vpop.eup %4432 }
 0x40d   :  { %769 = vadd.xlane.f32.xlu1 %v768_v46  ;;  %4436 = vpow2.f32 %v1275_v55  ;;  %v4207_v55 = vpack.c.bf16 %v1539_v53, %v1538_v52 }
 0x40e   :  { %4438 = vpow2.f32 %v1104_v56 }
 0x40f   :  { %v4435_v58 = vpop.eup %4434 }
 0x410   :  { %v939_v60 = vsel %vm175_vm2, %v4435_v58, 0.0 }
 0x417   :  { %429 = vrot.lane.b32.xlu0 %v4691_v40, %s4580_s18  ;;  %v596_v40 = vsel %vm175_vm2, %v4433_v57, 0.0  ;;  %v4791_v61 = vpop.eup %4436 }
 0x418   :  { %v1277_v2 = vsel %vm175_vm2, %v4791_v61, 0.0  ;;  %v4795_v3 = vpop.eup %4438 }
 0x419   :  { %v1106_v4 = vsel %vm175_vm2, %v4795_v3, 0.0 }
 0x41e   :  { %1111 = vrot.lane.b32.xlu1 %v4705_v41, %s4580_s18 }
 0x436   :  { %597 = vadd.xlane.f32.xlu0 %v596_v40 }
 0x439   :  { %v1444_v59 = vpop.xlane.xlu1 %1443 }
 0x43a   :  { %v1445_v62 = vsub.f32 %v1441_v24, %v1444_v59  ;;  %940 = vadd.xlane.f32.xlu0 %v939_v60 }
 0x43c   :  { %v1446_v63 = vmul.f32 1.442695, %v1445_v62 }
 0x43d   :  { %v602_v7 = vpop.permute.xlu1 %601 }
 0x43e   :  { %4440 = vpow2.f32 %v1446_v63  ;;  %1278 = vadd.xlane.f32.xlu0 %v1277_v2 }
 0x441   :  { %v774_v8 = vpop.permute.xlu1 %773 }
 0x442   :  { %1107 = vadd.xlane.f32.xlu1 %v1106_v4 }
 0x445   :  { %v945_v9 = vpop.permute.xlu1 %944 }
 0x448   :  { %v4799_v5 = vpop.eup %4440 }
 0x449   :  { %v1448_v6 = vsel %vm175_vm2, %v4799_v5, 0.0 }
 0x44a   :  { %1449 = vadd.xlane.f32.xlu0 %v1448_v6 }
 0x453   :  { %1453 = vrot.lane.b32.xlu1 %v4705_v41, %s4579_s17 }
 0x460   :  { %1282 = vrot.lane.b32.xlu0 %v4705_v41, %s4578_s0 }
 0x48e   :  { %v259_v10 = vpop.xlane.xlu0 %258 }
 0x48f   :  { %4442 = vrcp.f32 %v259_v10  ;;  %v426_v11 = vpop.xlane.xlu1 %425 }
 0x490   :  { %4444 = vrcp.f32 %v426_v11 }
 0x492   :  { %v430_v17 = vpop.permute.xlu0 %429 }
 0x499   :  { %v4443_v12 = vpop.eup %4442 }
 0x49a   :  { %v4445_v13 = vpop.eup %4444  ;;  %v261_v14 = vmul.f32 %v4443_v12, %v4427_v35  ;;  %v770_v15 = vpop.xlane.xlu1 %769 }
 0x49b   :  { %v428_v16 = vmul.f32 %v4445_v13, %v4429_v38  ;;  %4446 = vrcp.f32 %v770_v15 }
 0x49c   :  { %3609 = vst.msk [vmem:[#allocation5] sm:$0xff] %vm175_vm2, %v261_v14  ;;  %3918 = vmatmul.mubr.msk.f32.vlgmr.msra.gmra.mrb[4].mxu1 %vm175_vm2, %v261_v14 }
 0x49d   :  { %3610 = vst.msk [vmem:[#allocation5 + $0x8] sm:$0xff] %vm175_vm2, %v428_v16  ;;  %3926 = vmatpush3.msra.mxu1 %v430_v17  ;;  %3927 = vmatprep.mubr.msk.f32.mxu1 %vm4569_vm1, %v4568_v36 }
 0x49e   :  { %3935 = vmatprep.subr.mxu1 %v4568_v36  ;;  %v1112_v21 = vpop.permute.xlu1 %1111 }
 0x4a0   :  { %3928 = vmatmul.mubr.msk.f32.vlgmr.msra.gmra.mrb[6].mxu1 %vm175_vm2, %v428_v16 }
 0x4a1   :  { %3936 = vmatpush3.msra.mxu1 %v602_v7  ;;  %3937 = vmatprep.mubr.msk.f32.mxu1 %vm4569_vm1, %v4568_v36 }
 0x4a2   :  { %3945 = vmatprep.subr.mxu1 %v4568_v36 }
 0x4a5   :  { %v4447_v41 = vpop.eup %4446 }
 0x4a6   :  { %v772_v18 = vmul.f32 %v4447_v41, %v4782_v45 }
 0x4a8   :  { %3612 = vst.msk [vmem:[#allocation5 + $0x18] sm:$0xff] %vm175_vm2, %v772_v18 }
 0x4c3   :  { %v598_v19 = vpop.xlane.xlu0 %597 }
 0x4c4   :  { %4448 = vrcp.f32 %v598_v19 }
 0x4c7   :  { %v941_v20 = vpop.xlane.xlu0 %940 }
 0x4c8   :  { %4450 = vrcp.f32 %v941_v20 }
 0x4cb   :  { %v1279_v22 = vpop.xlane.xlu0 %1278 }
 0x4cc   :  { %4452 = vrcp.f32 %v1279_v22 }
 0x4ce   :  { %v4449_v23 = vpop.eup %4448 }
 0x4cf   :  { %v600_v24 = vmul.f32 %v4449_v23, %v4433_v57  ;;  %v1108_v25 = vpop.xlane.xlu1 %1107  ;;  %v1761_v23 = vld [vmem:[%s5303_s4] sm:$0xff] }
 0x4d0   :  { %4454 = vrcp.f32 %v1108_v25 }
 0x4d1   :  { %3611 = vst.msk [vmem:[#allocation5 + $0x10] sm:$0xff] %vm175_vm2, %v600_v24  ;;  %3938 = vmatmul.mubr.msk.f32.vlgmr.msra.gmra.mrb[8].mxu1 %vm175_vm2, %v600_v24  ;;  %v1762_v24 = vld [vmem:[%s5303_s4 + $0x8] sm:$0xff] }
 0x4d2   :  { %v4451_v26 = vpop.eup %4450  ;;  %3946 = vmatpush3.msra.mxu1 %v774_v8  ;;  %3947 = vmatprep.mubr.msk.f32.mxu1 %vm4569_vm1, %v4568_v36  ;;  %v3703_v8 = vld [vmem:[%s5306_s7 + $0x6] ss:$0 sm:$0xff]  ;;  %v4219_v25 = vpack.c.bf16 %v1762_v24, %v1761_v23 }
 0x4d3   :  { %v943_v27 = vmul.f32 %v4451_v26, %v4435_v58  ;;  %3955 = vmatprep.subr.mxu1 %v4568_v36  ;;  %v1454_v34 = vpop.permute.xlu1 %1453  ;;  %v1763_v26 = vld [vmem:[%s5303_s4 + $0x10] sm:$0xff] }
 0x4d4   :  { %4220 = vmatprep.subr.bf16.mxu0 %v4219_v25 }
 0x4d5   :  { %3613 = vst.msk [vmem:[#allocation5 + $0x20] sm:$0xff] %vm175_vm2, %v943_v27  ;;  %3948 = vmatmul.mubr.msk.f32.vlgmr.msra.gmra.mrb[10].mxu1 %vm175_vm2, %v772_v18  ;;  %4222 = vmatpush3.bf16.msra.mxu0 %v4219_v25 }
 0x4d6   :  { %v4453_v28 = vpop.eup %4452  ;;  %3956 = vmatpush3.msra.mxu1 %v945_v9  ;;  %3957 = vmatprep.mubr.msk.f32.mxu1 %vm4569_vm1, %v4568_v36 }
 0x4d7   :  { %v1281_v29 = vmul.f32 %v4453_v28, %v4791_v61  ;;  %v1450_v30 = vpop.xlane.xlu0 %1449  ;;  %3965 = vmatprep.subr.mxu1 %v4568_v36 }
 0x4d8   :  { %4456 = vrcp.f32 %v1450_v30  ;;  %v37_v30 = vld [vmem:[%s5300_s1 + $0x8] sm:$0xff] }
 0x4d9   :  { %3615 = vst.msk [vmem:[#allocation5 + $0x30] sm:$0xff] %vm175_vm2, %v1281_v29  ;;  %3958 = vmatmul.mubr.msk.f32.vlgmr.msra.gmra.mrb[12].mxu1 %vm175_vm2, %v943_v27  ;;  %v1764_v27 = vld [vmem:[%s5303_s4 + $0x18] sm:$0xff] }
 0x4da   :  { %v4455_v31 = vpop.eup %4454  ;;  %3966 = vmatpush3.msra.mxu1 %v1112_v21  ;;  %3967 = vmatprep.mubr.msk.f32.mxu1 %vm4569_vm1, %v4568_v36  ;;  %v4223_v28 = vpack.c.bf16 %v1764_v27, %v1763_v26 }
 0x4db   :  { %v1110_v32 = vmul.f32 %v4455_v31, %v4795_v3  ;;  %v1283_v33 = vpop.permute.xlu0 %1282  ;;  %3975 = vmatprep.subr.mxu1 %v4568_v36  ;;  %v3706_v31 = vld [vmem:[%s5301_s2 + $0x20] sm:$0xff] }
 0x4dc   :  { %4224 = vmatprep.subr.bf16.mxu0 %v4223_v28 }
 0x4dd   :  { %3614 = vst.msk [vmem:[#allocation5 + $0x28] sm:$0xff] %vm175_vm2, %v1110_v32  ;;  %3968 = vmatmul.mubr.msk.f32.vlgmr.msra.gmra.mrb[14].mxu1 %vm175_vm2, %v1110_v32  ;;  %4226 = vmatpush3.bf16.msra.mxu0 %v4223_v28  ;;  %v3707_v32 = vld [vmem:[%s5301_s2 + $0x28] sm:$0xff] }
 0x4de   :  { %3976 = vmatpush3.msra.mxu1 %v1283_v33  ;;  %3977 = vmatprep.mubr.msk.f32.mxu1 %vm4569_vm1, %v4568_v36  ;;  %v4211_v33 = vpack.c.bf16 %v3707_v32, %v3706_v31 }
 0x4df   :  { %3985 = vmatprep.subr.mxu1 %v4568_v36 }
 0x4e1   :  { %3978 = vmatmul.mubr.msk.f32.vlgmr.msra.gmra.mrb[16].mxu1 %vm175_vm2, %v1281_v29  ;;  %v36_v29 = vld [vmem:[%s5300_s1] sm:$0xff] }
 0x4e2   :  { %v4457_v35 = vpop.eup %4456  ;;  %3986 = vmatpush3.msra.mxu1 %v1454_v34  ;;  %3987 = vmatprep.mubr.msk.f32.mxu1 %vm4569_vm1, %v4568_v36  ;;  %v3708_v34 = vld [vmem:[%s5301_s2 + $0x30] sm:$0xff] }
 0x4e3   :  { %v1452_v37 = vmul.f32 %v4457_v35, %v4799_v5  ;;  %4204 = vmatprep.subr.bf16.mxu1 %v4203_v50  ;;  %4020 = vmatprep.mubr.msk.f32.mxu0 %vm42_vm0, %v36_v29  ;;  %v3709_v35 = vld [vmem:[%s5301_s2 + $0x38] sm:$0xff] }
 0x4e4   :  { %4021 = vmatmul.mubr.msk.f32.vlgmr.msra.gmra.mrb[14].mxu0 %vm42_vm0, %v37_v30 }
 0x4e5   :  { %3616 = vst.msk [vmem:[#allocation5 + $0x38] sm:$0xff] %vm175_vm2, %v1452_v37  ;;  %3988 = vmatmul.mubr.msk.f32.vlgmr.msra.gmra.mrb[18].mxu1 %vm175_vm2, %v1452_v37  ;;  %v4215_v37 = vpack.c.bf16 %v3709_v35, %v3708_v34 }
 0x4e6   :  { %4206 = vmatpush3.bf16.msra.mxu1 %v4203_v50  ;;  %v3705_v50 = vld [vmem:[%s5306_s7 + $0x3] ss:$0 sm:$0xff] }
 0x4e7   :  { %4208 = vmatprep.subr.bf16.mxu1 %v4207_v55 }
 0x4ea   :  { %4210 = vmatpush3.bf16.msra.mxu1 %v4207_v55 }
 0x4eb   :  { %4212 = vmatprep.subr.bf16.mxu1 %v4211_v33 }
 0x56f   :  { %v334_v38 = vpop.f32.mrb[4].mxu1 }
 0x570   :  { %338 = vst.msk [vmem:[#allocation2] sm:$0xff] %vm175_vm2, %v334_v38  ;;  %v3919_v39 = vpop.f32.mrb[5].mxu1  ;;  %v4584_v38 = vmov 0.0|0.0  }
 0x571   :  { %4234 = vmatprep.subr.bf16.mxu0 %v4584_v38 }
 0x573   :  { %v501_v42 = vpop.f32.mrb[6].mxu1 }
 0x574   :  { %506 = vrot.lane.b32.xlu0 %v501_v42, %s4581_s19  ;;  %v3929_v43 = vpop.f32.mrb[7].mxu1 }
 0x5a4   :  { %v673_v44 = vpop.f32.mrb[8].mxu1 }
 0x5a5   :  { %678 = vrot.lane.b32.xlu1 %v673_v44, %s4582_s20  ;;  %v3939_v45 = vpop.f32.mrb[9].mxu1 }
 0x5a8   :  { %v845_v46 = vpop.f32.mrb[10].mxu1 }
 0x5a9   :  { %850 = vrot.lane.b32.xlu1 %v845_v46, %s4583_s21  ;;  %v3949_v47 = vpop.f32.mrb[11].mxu1 }
 0x5ac   :  { %v1016_v51 = vpop.f32.mrb[12].mxu1 }
 0x5ad   :  { %1020 = vst.msk [vmem:[#allocation2 + $0x8] sm:$0xff] %vm175_vm2, %v1016_v51  ;;  %v3959_v54 = vpop.f32.mrb[13].mxu1 }
 0x5b0   :  { %v1183_v56 = vpop.f32.mrb[14].mxu1 }
 0x5b1   :  { %1188 = vrot.lane.b32.xlu0 %v1183_v56, %s4581_s19  ;;  %v3969_v57 = vpop.f32.mrb[15].mxu1 }
 0x5b2   :  { %v3713_v57 = vld [vmem:[%s5306_s7 + $0xb] ss:$0 sm:$0xff] }
 0x5b4   :  { %v1354_v40 = vpop.f32.mrb[16].mxu1 }
 0x5b5   :  { %1359 = vrot.lane.b32.xlu0 %v1354_v40, %s4582_s20  ;;  %v3979_v58 = vpop.f32.mrb[17].mxu1 }
 0x5b7   :  { %v4022_v40 = vpop.f32.mrb[14].mxu0 }
 0x5b8   :  { %v1525_v59 = vpop.f32.mrb[18].mxu1  ;;  %v1854_v58 = vadd.f32 %v4022_v40, %v3713_v57 }
 0x5b9   :  { %1530 = vrot.lane.b32.xlu1 %v1525_v59, %s4583_s21  ;;  %v3989_v60 = vpop.f32.mrb[19].mxu1  ;;  %v1848_v59 = vpop.f32.mrb[15].mxu0 }
 0x5ba   :  { %v1849_v60 = vadd.f32 %v3713_v57, %v1848_v59 }
 0x5e6   :  { %v507_v61 = vpop.permute.xlu0 %506 }
 0x5e7   :  { %510 = vst.msk [vmem:[#allocation2] sm:$0xff] %vm509_vm3, %v507_v61 }
 0x617   :  { %v679_v62 = vpop.permute.xlu1 %678 }
 0x618   :  { %682 = vst.msk [vmem:[#allocation2] sm:$0xff] %vm681_vm4, %v679_v62  ;;  %v4945_v62 = vpack.i.bf16 %v1854_v58, %v1849_v60 }
 0x61b   :  { %v851_v63 = vpop.permute.xlu1 %850 }
 0x61c   :  { %854 = vst.msk [vmem:[#allocation2] sm:$0xff] %vm853_vm5, %v851_v63  ;;  %v4228_v63 = vpack.c.bf16 %v1854_v58, %v1849_v60 }
 0x623   :  { %v1189_v2 = vpop.permute.xlu0 %1188  ;;  %v1534_v3 = vld [vmem:[#allocation2] sm:$0xff] }
 0x624   :  { %1191 = vst.msk [vmem:[#allocation2 + $0x8] sm:$0xff] %vm509_vm3, %v1189_v2  ;;  %3998 = vmatprep.mubr.msk.f32.mxu1 %vm42_vm0, %v1534_v3  ;;  %v38_v2 = vld [vmem:[%s5300_s1 + $0x10] sm:$0xff]  ;;  %v39_v3 = vld [vmem:[%s5300_s1 + $0x18] sm:$0xff] }
 0x625   :  { %4023 = vmatprep.mubr.msk.f32.mxu0 %vm42_vm0, %v38_v2 }
 0x626   :  { %4024 = vmatmul.mubr.msk.f32.gmra.mrb[16].mxu0 %vm42_vm0, %v39_v3 }
 0x627   :  { %v1360_v4 = vpop.permute.xlu0 %1359  ;;  %4044 = vmatprep.mubr.msk.f32.mxu0 %vm4569_vm1, %v4568_v36 }
 0x628   :  { %1362 = vst.msk [vmem:[#allocation2 + $0x8] sm:$0xff] %vm681_vm4, %v1360_v4 }
 0x62b   :  { %v1531_v5 = vpop.permute.xlu1 %1530 }
 0x62c   :  { %1533 = vst.msk [vmem:[#allocation2 + $0x8] sm:$0xff] %vm853_vm5, %v1531_v5 }
 0x633   :  { %v1535_v6 = vld [vmem:[#allocation2 + $0x8] sm:$0xff] }
 0x634   :  { %3999 = vmatmul.mubr.msk.f32.vlgmr.msra.gmra.mrb[20].mxu1 %vm42_vm0, %v1535_v6 }
 0x635   :  { %4214 = vmatpush3.bf16.msra.mxu1 %v4211_v33 }
 0x636   :  { %4216 = vmatprep.subr.bf16.mxu1 %v4215_v37 }
 0x639   :  { %4218 = vmatpush3.bf16.msra.mxu1 %v4215_v37 }
 0x63a   :  { %4227 = vmatprep.subr.bf16.mxu1 %v4584_v38 }
 0x707   :  { %v4000_v7 = vpop.f32.mrb[20].mxu1 }
 0x708   :  { %v1622_v9 = vadd.f32 %v4000_v7, %v4652_v1  ;;  %v1612_v10 = vpop.f32.mrb[21].mxu1 }
 0x709   :  { %v1621_v11 = vadd.f32 %v1612_v10, %v4647_v0 }
 0x70a   :  { %v4880_v12 = vadd.f32 %v3703_v8, %v1622_v9 }
 0x70b   :  { %v4882_v13 = vadd.f32 %v3703_v8, %v1621_v11  ;;  %v3710_v8 = vld [vmem:[%s5306_s7 + $0x7] ss:$0 sm:$0xff] }
 0x70c   :  { %v1635_v14 = vsel %vm42_vm0, %v4880_v12, 0.0 }
 0x70d   :  { %1636 = vadd.xlane.f32.xlu1 %v1635_v14  ;;  %v1632_v15 = vsel %vm42_vm0, %v4882_v13, 0.0 }
 0x70e   :  { %1633 = vadd.xlane.f32.xlu0 %v1632_v15  ;;  %v4025_v15 = vpop.f32.mrb[16].mxu0 }
 0x79a   :  { %v1637_v16 = vpop.xlane.xlu1 %1636 }
 0x79b   :  { %v1639_v17 = vmul.f32 0.03125, %v1637_v16  ;;  %v1634_v41 = vpop.xlane.xlu0 %1633  ;;  %v1858_v16 = vpop.f32.mrb[17].mxu0 }
 0x79c   :  { %v1638_v18 = vmul.f32 0.03125, %v1634_v41 }
 0x79d   :  { %v1641_v1 = vsub.f32 %v4880_v12, %v1639_v17 }
 0x79e   :  { %v1640_v0 = vsub.f32 %v4882_v13, %v1638_v18 }
 0x79f   :  { %v1643_v21 = vmul.f32 %v1641_v1, %v1641_v1 }
 0x7a0   :  { %v1642_v19 = vmul.f32 %v1640_v0, %v1640_v0 }
 0x7a1   :  { %v1647_v22 = vsel %vm42_vm0, %v1643_v21, 0.0  ;;  %v4993_v21 = vadd.f32 %v3713_v57, %v1858_v16 }
 0x7a2   :  { %v1644_v20 = vsel %vm42_vm0, %v1642_v19, 0.0 }
 0x7a3   :  { %1645 = vadd.xlane.f32.xlu0 %v1644_v20  ;;  %v4991_v20 = vadd.f32 %v4025_v15, %v3713_v57 }
 0x7a5   :  { %v4256_v23 = vpack.c.bf16 %v4991_v20, %v4993_v21 }
 0x7a7   :  { %1648 = vadd.xlane.f32.xlu0 %v1647_v22  ;;  %v4997_v22 = vpack.i.bf16 %v4991_v20, %v4993_v21 }
 0x7bd   :  { %4353 = vrot.lane.b32.xlu0 %v4945_v62, %s4572_s11 }
 0x830   :  { %v1646_v39 = vpop.xlane.xlu0 %1645 }
 0x831   :  { %v1650_v42 = vmul.f32 0.03125, %v1646_v39 }
 0x833   :  { %v1652_v43 = vadd.f32 1e-05, %v1650_v42 }
 0x834   :  { %v1649_v44 = vpop.xlane.xlu0 %1648 }
 0x835   :  { %4458 = vrsqrt.f32 %v1652_v43  ;;  %v1651_v45 = vmul.f32 0.03125, %v1649_v44 }
 0x837   :  { %v1653_v46 = vadd.f32 1e-05, %v1651_v45 }
 0x838   :  { %v4354_v4 = vpop.permute.xlu0 %4353 }
 0x839   :  { %4460 = vrsqrt.f32 %v1653_v46  ;;  %v4356_v5 = vunpack.i.h.bf16 %v4354_v4  ;;  %v4355_v6 = vunpack.i.l.bf16 %v4354_v4 }
 0x83b   :  { %v4235_v7 = vpack.c.bf16 %v4356_v5, %v4355_v6 }
 0x83d   :  { %4237 = vmatpush3.bf16.xpose.msk.msra.mxu0 %vm4941_vm6, %v4235_v7 }
 0x83e   :  { %4241 = vmatprep.subr.bf16.mxu0 %v4584_v38 }
 0x83f   :  { %v4459_v47 = vpop.eup %4458 }
 0x840   :  { %v1656_v49 = vmul.f32 %v4459_v47, %v1640_v0 }
 0x842   :  { %v1662_v51 = vmul.f32 %v3704_v48, %v1656_v49 }
 0x843   :  { %v4461_v52 = vpop.eup %4460 }
 0x844   :  { %v1657_v53 = vmul.f32 %v4461_v52, %v1641_v1  ;;  %v1668_v54 = vadd.f32 %v3705_v50, %v1662_v51 }
 0x846   :  { %v1663_v55 = vmul.f32 %v3704_v48, %v1657_v53  ;;  %4009 = vmatprep.mubr.msk.f32.mxu1 %vm42_vm0, %v1668_v54 }
 0x848   :  { %v1669_v56 = vadd.f32 %v3705_v50, %v1663_v55 }
 0x84a   :  { %4010 = vmatmul.mubr.msk.f32.vlgmr.msra.gmra.mrb[22].mxu1 %vm42_vm0, %v1669_v56 }
 0x84b   :  { %4030 = vmatprep.mubr.msk.f32.mxu1 %vm4569_vm1, %v4568_v36  ;;  %4230 = vmatpush3.bf16.xpose.msk.msra.mxu1 %vm4941_vm6, %v4228_v63 }
 0x84c   :  { %4231 = vmatprep.subr.bf16.mxu1 %v4584_v38 }
 0x91d   :  { %v4011_v9 = vpop.f32.mrb[22].mxu1 }
 0x91e   :  { %v4968_v10 = vadd.f32 %v4011_v9, %v3710_v8  ;;  %v1752_v11 = vpop.f32.mrb[23].mxu1 }
 0x91f   :  { %v4970_v14 = vadd.f32 %v3710_v8, %v1752_v11 }
 0x921   :  { %2039 = vrot.lane.b32.xlu1 %v4970_v14, %s4572_s11  ;;  %4031 = vmatmul.mubr.msk.f32.vlgmr.msra.gmra.mrb[24].mxu1 %vm175_vm2, %v4970_v14 }
 0x922   :  { %4037 = vmatprep.mubr.msk.f32.mxu1 %vm4569_vm1, %v4568_v36 }
 0x925   :  { %4358 = vrot.lane.b32.xlu1 %v4945_v62, %s4573_s12 }
 0x929   :  { %2217 = vrot.lane.b32.xlu1 %v4970_v14, %s4573_s12 }
 0x993   :  { %v2040_v17 = vpop.permute.xlu1 %2039 }
 0x994   :  { %4045 = vmatmul.mubr.msk.f32.vlgmr.msra.gmra.mrb[18].mxu0 %vm175_vm2, %v2040_v17 }
 0x995   :  { %4058 = vmatprep.mubr.msk.f32.mxu0 %vm4569_vm1, %v4568_v36 }
 0x997   :  { %v4359_v41 = vpop.permute.xlu1 %4358 }
 0x998   :  { %v4361_v18 = vunpack.i.h.bf16 %v4359_v41  ;;  %v4360_v1 = vunpack.i.l.bf16 %v4359_v41 }
 0x99a   :  { %v4242_v0 = vpack.c.bf16 %v4361_v18, %v4360_v1 }
 0x99b   :  { %v2218_v19 = vpop.permute.xlu1 %2217 }
 0x99c   :  { %4244 = vmatpush3.bf16.xpose.msk.msra.mxu0 %vm4941_vm6, %v4242_v0 }
 0x99d   :  { %4252 = vmatprep.subr.bf16.mxu0 %v4584_v38 }
 0x9a3   :  { %4059 = vmatmul.mubr.msk.f32.vlgmr.msra.gmra.mrb[20].mxu0 %vm175_vm2, %v2218_v19 }
 0x9a4   :  { %4079 = vmatprep.mubr.msk.f32.mxu0 %vm4569_vm1, %v4568_v36 }
 0x9f4   :  { %v1942_v24 = vpop.f32.mrb[24].mxu1 }
 0x9f5   :  { %v1946_v25 = vmul.f32 0.35355338, %v1942_v24  ;;  %v4032_v26 = vpop.f32.mrb[25].mxu1 }
 0x9f7   :  { %v1948_v27 = vsel %vm1947_vm7, %v1946_v25, -inf }
 0x9f8   :  { %1949 = vmax.xlane.f32.xlu0 %v1948_v27 }
 0xa67   :  { %v2117_v28 = vpop.f32.mrb[18].mxu0 }
 0xa68   :  { %v2121_v29 = vmul.f32 0.35355338, %v2117_v28  ;;  %v4046_v30 = vpop.f32.mrb[19].mxu0 }
 0xa6a   :  { %v2122_v31 = vsel %vm1947_vm7, %v2121_v29, -inf }
 0xa6b   :  { %2123 = vmax.xlane.f32.xlu1 %v2122_v31 }
 0xa76   :  { %v2295_v32 = vpop.f32.mrb[20].mxu0 }
 0xa77   :  { %v2299_v33 = vmul.f32 0.35355338, %v2295_v32  ;;  %v4060_v34 = vpop.f32.mrb[21].mxu0 }
 0xa79   :  { %v2300_v35 = vsel %vm1947_vm7, %v2299_v33, -inf }
 0xa7a   :  { %2301 = vmax.xlane.f32.xlu0 %v2300_v35 }
 0xa7c   :  { %4368 = vrot.lane.b32.xlu1 %v4945_v62, %s4570_s29 }
 0xa80   :  { %4373 = vrot.lane.b32.xlu1 %v4945_v62, %s4574_s13 }
 0xa85   :  { %v1950_v37 = vpop.xlane.xlu0 %1949 }
 0xa86   :  { %v1951_v39 = vsub.f32 %v1946_v25, %v1950_v37 }
 0xa88   :  { %v1952_v42 = vmul.f32 1.442695, %v1951_v39 }
 0xa8a   :  { %4462 = vpow2.f32 %v1952_v42 }
 0xa94   :  { %v4463_v43 = vpop.eup %4462 }
 0xa95   :  { %v1954_v44 = vsel %vm1947_vm7, %v4463_v43, 0.0 }
 0xa96   :  { %1955 = vadd.xlane.f32.xlu0 %v1954_v44 }
 0xaf8   :  { %v2124_v45 = vpop.xlane.xlu1 %2123 }
 0xaf9   :  { %v2125_v46 = vsub.f32 %v2121_v29, %v2124_v45 }
 0xafb   :  { %v2126_v47 = vmul.f32 1.442695, %v2125_v46 }
 0xafc   :  { %v4369_v58 = vpop.permute.xlu1 %4368 }
 0xafd   :  { %4464 = vpow2.f32 %v2126_v47  ;;  %v4371_v2 = vunpack.i.h.bf16 %v4369_v58  ;;  %v4370_v3 = vunpack.i.l.bf16 %v4369_v58 }
 0xaff   :  { %v4239_v7 = vpack.c.bf16 %v4371_v2, %v4370_v3 }
 0xb00   :  { %v4374_v5 = vpop.permute.xlu1 %4373 }
 0xb01   :  { %v4376_v8 = vunpack.i.h.bf16 %v4374_v5  ;;  %v4375_v9 = vunpack.i.l.bf16 %v4374_v5 }
 0xb07   :  { %v4465_v48 = vpop.eup %4464  ;;  %v2302_v49 = vpop.xlane.xlu0 %2301 }
 0xb08   :  { %v2303_v50 = vsub.f32 %v2299_v33, %v2302_v49  ;;  %v2128_v51 = vsel %vm1947_vm7, %v4465_v48, 0.0 }
 0xb09   :  { %2129 = vadd.xlane.f32.xlu0 %v2128_v51 }
 0xb0a   :  { %v2304_v52 = vmul.f32 1.442695, %v2303_v50 }
 0xb0c   :  { %4466 = vpow2.f32 %v2304_v52 }
 0xb16   :  { %v4467_v53 = vpop.eup %4466 }
 0xb17   :  { %v2306_v54 = vsel %vm1947_vm7, %v4467_v53, 0.0 }
 0xb18   :  { %2307 = vadd.xlane.f32.xlu1 %v2306_v54 }
 0xb1f   :  { %4363 = vrot.lane.b32.xlu0 %v4945_v62, %s4571_s30 }
 0xb23   :  { %2395 = vrot.lane.b32.xlu0 %v4970_v14, %s4575_s14  ;;  %v1956_v55 = vpop.xlane.xlu0 %1955  ;;  %v4246_v14 = vpack.c.bf16 %v4376_v8, %v4375_v9 }
 0xb24   :  { %4468 = vrcp.f32 %v1956_v55 }
 0xb29   :  { %4378 = vrot.lane.b32.xlu1 %v4945_v62, %s4575_s14 }
 0xb2e   :  { %v4469_v56 = vpop.eup %4468 }
 0xb2f   :  { %v1958_v57 = vmul.f32 %v4469_v56, %v4463_v43 }
 0xb31   :  { %3617 = vst.msk [vmem:[#allocation7] sm:$0xff] %vm1947_vm7, %v1958_v57 }
 0xb96   :  { %v2130_v40 = vpop.xlane.xlu0 %2129 }
 0xb97   :  { %4470 = vrcp.f32 %v2130_v40 }
 0xb9a   :  { %v4364_v59 = vpop.permute.xlu0 %4363 }
 0xb9b   :  { %v4366_v60 = vunpack.i.h.bf16 %v4364_v59  ;;  %v4365_v63 = vunpack.i.l.bf16 %v4364_v59 }
 0xb9d   :  { %v4232_v4 = vpack.c.bf16 %v4366_v60, %v4365_v63 }
 0xb9e   :  { %v2396_v19 = vpop.permute.xlu0 %2395 }
 0xb9f   :  { %4233 = vmatpush3.bf16.msra.mxu1 %v4232_v4 }
 0xba0   :  { %4238 = vmatprep.subr.bf16.mxu1 %v4584_v38 }
 0xba1   :  { %v4471_v6 = vpop.eup %4470 }
 0xba2   :  { %v2132_v11 = vmul.f32 %v4471_v6, %v4465_v48  ;;  %4038 = vmatmul.mubr.msk.f32.vlgmr.msra.gmra.mrb[26].mxu1 %vm1947_vm7, %v1958_v57 }
 0xba3   :  { %4240 = vmatpush3.bf16.msra.mxu1 %v4239_v7  ;;  %4051 = vmatprep.mubr.msk.f32.mxu1 %vm4569_vm1, %v4568_v36 }
 0xba4   :  { %3618 = vst.msk [vmem:[#allocation7 + $0x8] sm:$0xff] %vm1947_vm7, %v2132_v11  ;;  %4245 = vmatprep.subr.bf16.mxu1 %v4584_v38 }
 0xba5   :  { %v2308_v15 = vpop.xlane.xlu1 %2307 }
 0xba6   :  { %4472 = vrcp.f32 %v2308_v15  ;;  %4052 = vmatmul.mubr.msk.f32.vlgmr.msra.gmra.mrb[28].mxu1 %vm1947_vm7, %v2132_v11 }
 0xba7   :  { %4247 = vmatpush3.bf16.msra.mxu1 %v4246_v14  ;;  %4065 = vmatprep.mubr.msk.f32.mxu1 %vm4569_vm1, %v4568_v36 }
 0xba8   :  { %4248 = vmatprep.subr.bf16.mxu1 %v4584_v38 }
 0xba9   :  { %v4379_v16 = vpop.permute.xlu1 %4378 }
 0xbaa   :  { %v4381_v17 = vunpack.i.h.bf16 %v4379_v16  ;;  %v4380_v41 = vunpack.i.l.bf16 %v4379_v16 }
 0xbac   :  { %v4249_v0 = vpack.c.bf16 %v4381_v17, %v4380_v41 }
 0xbb0   :  { %v4473_v18 = vpop.eup %4472 }
 0xbb1   :  { %v2310_v1 = vmul.f32 %v4473_v18, %v4467_v53 }
 0xbb3   :  { %3619 = vst.msk [vmem:[#allocation7 + $0x10] sm:$0xff] %vm1947_vm7, %v2310_v1  ;;  %4066 = vmatmul.mubr.msk.f32.vlgmr.msra.gmra.mrb[30].mxu1 %vm1947_vm7, %v2310_v1 }
 0xbb4   :  { %4251 = vmatpush3.bf16.xpose.msk.msra.mxu1 %vm4941_vm6, %v4249_v0  ;;  %4072 = vmatprep.mubr.msk.f32.mxu1 %vm4569_vm1, %v4568_v36 }
 0xbb5   :  { %4259 = vmatprep.subr.bf16.mxu1 %v4584_v38 }
 0xbbb   :  { %4073 = vmatmul.mubr.msk.f32.vlgmr.msra.gmra.mrb[32].mxu1 %vm175_vm2, %v2396_v19 }
 0xbbc   :  { %4093 = vmatprep.mubr.msk.f32.mxu1 %vm4569_vm1, %v4568_v36 }
 0xc75   :  { %v2034_v24 = vpop.f32.mrb[26].mxu1 }
 0xc76   :  { %2038 = vst.msk [vmem:[#allocation2] sm:$0xff] %vm175_vm2, %v2034_v24  ;;  %v4039_v25 = vpop.f32.mrb[27].mxu1 }
 0xc79   :  { %v5039_v26 = vpop.f32.mrb[28].mxu1 }
 0xc7a   :  { %v4053_v27 = vpop.f32.mrb[29].mxu1 }
 0xc86   :  { %v5041_v28 = vpop.f32.mrb[30].mxu1 }
 0xc87   :  { %v4067_v29 = vpop.f32.mrb[31].mxu1 }
 0xc8e   :  { %v2473_v30 = vpop.f32.mrb[32].mxu1 }
 0xc8f   :  { %v2477_v31 = vmul.f32 0.35355338, %v2473_v30  ;;  %v4074_v32 = vpop.f32.mrb[33].mxu1 }
 0xc91   :  { %v2478_v33 = vsel %vm1947_vm7, %v2477_v31, -inf }
 0xc92   :  { %2479 = vmax.xlane.f32.xlu1 %v2478_v33 }
 0xd1f   :  { %v2480_v34 = vpop.xlane.xlu1 %2479 }
 0xd20   :  { %v2481_v35 = vsub.f32 %v2477_v31, %v2480_v34 }
 0xd22   :  { %v2482_v37 = vmul.f32 1.442695, %v2481_v35 }
 0xd24   :  { %4474 = vpow2.f32 %v2482_v37 }
 0xd2e   :  { %v4475_v39 = vpop.eup %4474 }
 0xd2f   :  { %v2484_v42 = vsel %vm1947_vm7, %v4475_v39, 0.0 }
 0xd30   :  { %2485 = vadd.xlane.f32.xlu0 %v2484_v42 }
 0xd46   :  { %4383 = vrot.lane.b32.xlu0 %v4945_v62, %s4576_s15 }
 0xd4a   :  { %4393 = vrot.lane.b32.xlu0 %v4997_v22, %s4572_s11 }
 0xd4e   :  { %2744 = vrot.lane.b32.xlu0 %v4968_v10, %s4572_s11 }
 0xdbd   :  { %v2486_v43 = vpop.xlane.xlu0 %2485 }
 0xdbe   :  { %4476 = vrcp.f32 %v2486_v43 }
 0xdc1   :  { %v4384_v44 = vpop.permute.xlu0 %4383 }
 0xdc2   :  { %v4386_v45 = vunpack.i.h.bf16 %v4384_v44  ;;  %v4385_v46 = vunpack.i.l.bf16 %v4384_v44 }
 0xdc4   :  { %v4253_v47 = vpack.c.bf16 %v4386_v45, %v4385_v46 }
 0xdc5   :  { %v4394_v63 = vpop.permute.xlu0 %4393 }
 0xdc6   :  { %4254 = vmatpush3.bf16.msra.mxu0 %v4253_v47  ;;  %v4396_v3 = vunpack.i.h.bf16 %v4394_v63  ;;  %v4395_v4 = vunpack.i.l.bf16 %v4394_v63 }
 0xdc7   :  { %4255 = vmatprep.subr.bf16.mxu0 %v4584_v38 }
 0xdc8   :  { %v4477_v48 = vpop.eup %4476  ;;  %v4263_v6 = vpack.c.bf16 %v4396_v3, %v4395_v4 }
 0xdc9   :  { %v2488_v49 = vmul.f32 %v4477_v48, %v4475_v39  ;;  %v2745_v7 = vpop.permute.xlu0 %2744 }
 0xdcb   :  { %3620 = vst.msk [vmem:[#allocation7 + $0x18] sm:$0xff] %vm1947_vm7, %v2488_v49  ;;  %4080 = vmatmul.mubr.msk.f32.vlgmr.msra.gmra.mrb[22].mxu0 %vm1947_vm7, %v2488_v49 }
 0xdcc   :  { %4086 = vmatprep.mubr.msk.f32.mxu0 %vm4569_vm1, %v4568_v36 }
 0xdcf   :  { %4258 = vmatpush3.bf16.xpose.msk.msra.mxu0 %vm4941_vm6, %v4256_v23 }
 0xdd0   :  { %4266 = vmatprep.subr.bf16.mxu0 %v4584_v38 }
 0xdd6   :  { %4087 = vmatmul.mubr.msk.f32.vlgmr.msra.gmra.mrb[24].mxu0 %vm175_vm2, %v4968_v10 }
 0xdd7   :  { %4107 = vmatprep.mubr.msk.f32.mxu0 %vm4569_vm1, %v4568_v36 }
 0xe9e   :  { %v5066_v62 = vpop.f32.mrb[22].mxu0 }
 0xe9f   :  { %v4081_v50 = vpop.f32.mrb[23].mxu0 }
 0xea9   :  { %v2648_v51 = vpop.f32.mrb[24].mxu0 }
 0xeaa   :  { %v2652_v52 = vmul.f32 0.35355338, %v2648_v51  ;;  %v4088_v53 = vpop.f32.mrb[25].mxu0 }
 0xeac   :  { %v2653_v54 = vsel %vm1947_vm7, %v2652_v52, -inf }
 0xead   :  { %2654 = vmax.xlane.f32.xlu1 %v2653_v54 }
 0xf3a   :  { %v2655_v20 = vpop.xlane.xlu1 %2654 }
 0xf3b   :  { %v2656_v21 = vsub.f32 %v2652_v52, %v2655_v20 }
 0xf3d   :  { %v2657_v23 = vmul.f32 1.442695, %v2656_v21 }
 0xf3f   :  { %4478 = vpow2.f32 %v2657_v23 }
 0xf49   :  { %v4479_v55 = vpop.eup %4478 }
 0xf4a   :  { %v2659_v56 = vsel %vm1947_vm7, %v4479_v55, 0.0 }
 0xf4b   :  { %2660 = vadd.xlane.f32.xlu1 %v2659_v56 }
 0xf5c   :  { %4388 = vrot.lane.b32.xlu1 %v4997_v22, %s4571_s30 }
 0xfd8   :  { %v2661_v57 = vpop.xlane.xlu1 %2660 }
 0xfd9   :  { %4480 = vrcp.f32 %v2661_v57 }
 0xfdc   :  { %v4389_v40 = vpop.permute.xlu1 %4388 }
 0xfdd   :  { %v4391_v58 = vunpack.i.h.bf16 %v4389_v40  ;;  %v4390_v59 = vunpack.i.l.bf16 %v4389_v40 }
 0xfdf   :  { %v4260_v60 = vpack.c.bf16 %v4391_v58, %v4390_v59 }
 0xfe1   :  { %4261 = vmatpush3.bf16.msra.mxu1 %v4260_v60 }
 0xfe2   :  { %4262 = vmatprep.subr.bf16.mxu1 %v4584_v38 }
 0xfe3   :  { %v4481_v2 = vpop.eup %4480 }
 0xfe4   :  { %v2663_v5 = vmul.f32 %v4481_v2, %v4479_v55 }
 0xfe6   :  { %3621 = vst.msk [vmem:[#allocation7 + $0x20] sm:$0xff] %vm1947_vm7, %v2663_v5  ;;  %4094 = vmatmul.mubr.msk.f32.vlgmr.msra.gmra.mrb[34].mxu1 %vm1947_vm7, %v2663_v5 }
 0xfe7   :  { %4100 = vmatprep.mubr.msk.f32.mxu1 %vm4569_vm1, %v4568_v36 }
 0xfea   :  { %4265 = vmatpush3.bf16.xpose.msk.msra.mxu1 %vm4941_vm6, %v4263_v6 }
 0xfeb   :  { %4273 = vmatprep.subr.bf16.mxu1 %v4584_v38 }
 0xff1   :  { %4101 = vmatmul.mubr.msk.f32.vlgmr.msra.gmra.mrb[36].mxu1 %vm175_vm2, %v2745_v7 }
 0xff2   :  { %4121 = vmatprep.mubr.msk.f32.mxu1 %vm4569_vm1, %v4568_v36 }
0x10b9   :  { %v2739_v8 = vpop.f32.mrb[34].mxu1 }
0x10ba   :  { %2743 = vst.msk [vmem:[#allocation2 + $0x8] sm:$0xff] %vm175_vm2, %v2739_v8  ;;  %v4095_v9 = vpop.f32.mrb[35].mxu1 }
0x10c4   :  { %v2822_v11 = vpop.f32.mrb[36].mxu1 }
0x10c5   :  { %v2826_v14 = vmul.f32 0.35355338, %v2822_v11  ;;  %v4102_v15 = vpop.f32.mrb[37].mxu1 }
0x10c7   :  { %v2827_v16 = vsel %vm1947_vm7, %v2826_v14, -inf }
0x10c8   :  { %2828 = vmax.xlane.f32.xlu1 %v2827_v16 }
0x10d9   :  { %4403 = vrot.lane.b32.xlu1 %v4997_v22, %s4573_s12 }
0x10dd   :  { %2922 = vrot.lane.b32.xlu1 %v4968_v10, %s4573_s12 }
0x1155   :  { %v2829_v17 = vpop.xlane.xlu1 %2828 }
0x1156   :  { %v2830_v41 = vsub.f32 %v2826_v14, %v2829_v17 }
0x1158   :  { %v2831_v18 = vmul.f32 1.442695, %v2830_v41 }
0x1159   :  { %v4404_v30 = vpop.permute.xlu1 %4403 }
0x115a   :  { %4482 = vpow2.f32 %v2831_v18  ;;  %v4406_v32 = vunpack.i.h.bf16 %v4404_v30  ;;  %v4405_v33 = vunpack.i.l.bf16 %v4404_v30  ;;  %v3750_v18 = vld [vmem:[%s5301_s2 + $0x40] sm:$0xff] }
0x115c   :  { %v4270_v35 = vpack.c.bf16 %v4406_v32, %v4405_v33  ;;  %v3756_v33 = vld [vmem:[%s5306_s7 + $0x8] ss:$0 sm:$0xff] }
0x115d   :  { %v2923_v37 = vpop.permute.xlu1 %2922 }
0x1164   :  { %v4483_v1 = vpop.eup %4482 }
0x1165   :  { %v2833_v0 = vsel %vm1947_vm7, %v4483_v1, 0.0 }
0x1166   :  { %2834 = vadd.xlane.f32.xlu0 %v2833_v0 }
0x117c   :  { %4398 = vrot.lane.b32.xlu0 %v4997_v22, %s4570_s29 }
0x11f3   :  { %v2835_v19 = vpop.xlane.xlu0 %2834 }
0x11f4   :  { %4484 = vrcp.f32 %v2835_v19  ;;  %v3752_v19 = vld [vmem:[%s5301_s2 + $0x50] sm:$0xff] }
0x11f7   :  { %v4399_v24 = vpop.permute.xlu0 %4398 }
0x11f8   :  { %v4401_v25 = vunpack.i.h.bf16 %v4399_v24  ;;  %v4400_v27 = vunpack.i.l.bf16 %v4399_v24  ;;  %v3753_v24 = vld [vmem:[%s5301_s2 + $0x58] sm:$0xff] }
0x11fa   :  { %v4267_v29 = vpack.c.bf16 %v4401_v25, %v4400_v27  ;;  %v4287_v25 = vpack.c.bf16 %v3753_v24, %v3752_v19 }
0x11fc   :  { %4268 = vmatpush3.bf16.msra.mxu0 %v4267_v29 }
0x11fd   :  { %4269 = vmatprep.subr.bf16.mxu0 %v4584_v38 }
0x11fe   :  { %v4485_v31 = vpop.eup %4484 }
0x11ff   :  { %v2837_v34 = vmul.f32 %v4485_v31, %v4483_v1  ;;  %v3751_v1 = vld [vmem:[%s5301_s2 + $0x48] sm:$0xff] }
0x1200   :  { %v4283_v0 = vpack.c.bf16 %v3751_v1, %v3750_v18  ;;  %v3758_v1 = vld [vmem:[%s5306_s7 + $0x5] ss:$0 sm:$0xff] }
0x1201   :  { %3622 = vst.msk [vmem:[#allocation7 + $0x28] sm:$0xff] %vm1947_vm7, %v2837_v34  ;;  %4108 = vmatmul.mubr.msk.f32.vlgmr.msra.gmra.mrb[26].mxu0 %vm1947_vm7, %v2837_v34 }
0x1202   :  { %4114 = vmatprep.mubr.msk.f32.mxu0 %vm4569_vm1, %v4568_v36 }
0x1205   :  { %4272 = vmatpush3.bf16.xpose.msk.msra.mxu0 %vm4941_vm6, %v4270_v35 }
0x1206   :  { %4280 = vmatprep.subr.bf16.mxu0 %v4584_v38 }
0x120c   :  { %4115 = vmatmul.mubr.msk.f32.vlgmr.msra.gmra.mrb[28].mxu0 %vm175_vm2, %v2923_v37 }
0x120d   :  { %4135 = vmatprep.mubr.msk.f32.mxu0 %vm4569_vm1, %v4568_v36 }
0x12d4   :  { %v2913_v39 = vpop.f32.mrb[26].mxu0 }
0x12d5   :  { %v4109_v42 = vpop.f32.mrb[27].mxu0 }
0x12df   :  { %v3000_v43 = vpop.f32.mrb[28].mxu0 }
0x12e0   :  { %v3004_v44 = vmul.f32 0.35355338, %v3000_v43  ;;  %v4116_v45 = vpop.f32.mrb[29].mxu0 }
0x12e2   :  { %v3005_v46 = vsel %vm1947_vm7, %v3004_v44, -inf }
0x12e3   :  { %3006 = vmax.xlane.f32.xlu0 %v3005_v46 }
0x12f9   :  { %4408 = vrot.lane.b32.xlu0 %v4997_v22, %s4574_s13 }
0x12fd   :  { %3100 = vrot.lane.b32.xlu0 %v4968_v10, %s4575_s14 }
0x1370   :  { %v3007_v47 = vpop.xlane.xlu0 %3006 }
0x1371   :  { %v3008_v48 = vsub.f32 %v3004_v44, %v3007_v47 }
0x1373   :  { %v3009_v49 = vmul.f32 1.442695, %v3008_v48 }
0x1374   :  { %v4409_v50 = vpop.permute.xlu0 %4408 }
0x1375   :  { %4486 = vpow2.f32 %v3009_v49  ;;  %v4411_v51 = vunpack.i.h.bf16 %v4409_v50  ;;  %v4410_v52 = vunpack.i.l.bf16 %v4409_v50 }
0x1377   :  { %v4274_v53 = vpack.c.bf16 %v4411_v51, %v4410_v52 }
0x1379   :  { %4275 = vmatpush3.bf16.msra.mxu1 %v4274_v53  ;;  %v3415_v53 = vld [vmem:[%s5304_s5] sm:$0xff] }
0x137a   :  { %4276 = vmatprep.subr.bf16.mxu1 %v4584_v38  ;;  %v3101_v38 = vpop.permute.xlu0 %3100 }
0x137f   :  { %v4487_v54 = vpop.eup %4486 }
0x1380   :  { %v3011_v20 = vsel %vm1947_vm7, %v4487_v54, 0.0 }
0x1381   :  { %3012 = vadd.xlane.f32.xlu1 %v3011_v20 }
0x1392   :  { %4413 = vrot.lane.b32.xlu1 %v4997_v22, %s4575_s14  ;;  %s4585_s14 = smov [#allocation5]  }
0x140e   :  { %v3013_v21 = vpop.xlane.xlu1 %3012 }
0x140f   :  { %4488 = vrcp.f32 %v3013_v21  ;;  %v3417_v21 = vld [vmem:[%s5304_s5 + $0x10] sm:$0xff] }
0x1412   :  { %v4414_v10 = vpop.permute.xlu1 %4413 }
0x1413   :  { %v4416_v23 = vunpack.i.h.bf16 %v4414_v10  ;;  %v4415_v55 = vunpack.i.l.bf16 %v4414_v10  ;;  %v3418_v10 = vld [vmem:[%s5304_s5 + $0x18] sm:$0xff] }
0x1415   :  { %v4277_v40 = vpack.c.bf16 %v4416_v23, %v4415_v55  ;;  %v4295_v23 = vpack.c.bf16 %v3418_v10, %v3417_v21  ;;  %v3507_v55 = vld [vmem:[%s5305_s6] sm:$0xff] }
0x1419   :  { %v4489_v56 = vpop.eup %4488 }
0x141a   :  { %v3015_v57 = vmul.f32 %v4489_v56, %v4487_v54  ;;  %v3416_v54 = vld [vmem:[%s5304_s5 + $0x8] sm:$0xff] }
0x141b   :  { %v4291_v20 = vpack.c.bf16 %v3416_v54, %v3415_v53  ;;  %v3508_v56 = vld [vmem:[%s5305_s6 + $0x8] sm:$0xff] }
0x141c   :  { %3623 = vst.msk [vmem:[#allocation7 + $0x30] sm:$0xff] %vm1947_vm7, %v3015_v57  ;;  %4122 = vmatmul.mubr.msk.f32.vlgmr.msra.gmra.mrb[38].mxu1 %vm1947_vm7, %v3015_v57  ;;  %v3509_v57 = vld [vmem:[%s5305_s6 + $0x10] sm:$0xff] }
0x141d   :  { %4279 = vmatpush3.bf16.xpose.msk.msra.mxu1 %vm4941_vm6, %v4277_v40  ;;  %4128 = vmatprep.mubr.msk.f32.mxu1 %vm4569_vm1, %v4568_v36  ;;  %v4299_v40 = vpack.c.bf16 %v3508_v56, %v3507_v55 }
0x141e   :  { %4292 = vmatprep.subr.bf16.mxu1 %v4291_v20 }
0x1424   :  { %4129 = vmatmul.mubr.msk.f32.vlgmr.msra.gmra.mrb[40].mxu1 %vm175_vm2, %v3101_v38  ;;  %v3510_v38 = vld [vmem:[%s5305_s6 + $0x18] sm:$0xff] }
0x1425   :  { %4294 = vmatpush3.bf16.msra.mxu1 %v4291_v20 }
0x1426   :  { %4296 = vmatprep.subr.bf16.mxu1 %v4295_v23 }
0x1429   :  { %4298 = vmatpush3.bf16.msra.mxu1 %v4295_v23 }
0x14ef   :  { %v3091_v58 = vpop.f32.mrb[38].mxu1 }
0x14f0   :  { %v4123_v59 = vpop.f32.mrb[39].mxu1 }
0x14f1   :  { %v3511_v59 = vld [vmem:[%s5305_s6 + $0x20] sm:$0xff] }
0x14f7   :  { %v3178_v60 = vpop.f32.mrb[40].mxu1 }
0x14f8   :  { %v3182_v63 = vmul.f32 0.35355338, %v3178_v60  ;;  %v4130_v2 = vpop.f32.mrb[41].mxu1  ;;  %v3512_v60 = vld [vmem:[%s5305_s6 + $0x28] sm:$0xff] }
0x14f9   :  { %v3513_v2 = vld [vmem:[%s5305_s6 + $0x30] sm:$0xff] }
0x14fa   :  { %v3183_v3 = vsel %vm1947_vm7, %v3182_v63, -inf }
0x14fb   :  { %3184 = vmax.xlane.f32.xlu1 %v3183_v3  ;;  %v3514_v3 = vld [vmem:[%s5305_s6 + $0x38] sm:$0xff] }
0x150c   :  { %2213 = vrot.lane.b32.xlu1 %v5039_v26, %s4581_s19 }
0x1510   :  { %2391 = vrot.lane.b32.xlu1 %v5041_v28, %s4582_s20 }
0x1514   :  { %2569 = vrot.lane.b32.xlu1 %v5066_v62, %s4583_s21 }
0x1588   :  { %v3185_v36 = vpop.xlane.xlu1 %3184 }
0x1589   :  { %v3186_v61 = vsub.f32 %v3182_v63, %v3185_v36  ;;  %v4307_v63 = vpack.c.bf16 %v3512_v60, %v3511_v59  ;;  %v4311_v36 = vpack.c.bf16 %v3514_v3, %v3513_v2 }
0x158b   :  { %v3187_v4 = vmul.f32 1.442695, %v3186_v61  ;;  %v3515_v61 = vld [vmem:[%s5305_s6 + $0x40] sm:$0xff] }
0x158c   :  { %v2214_v5 = vpop.permute.xlu1 %2213 }
0x158d   :  { %4490 = vpow2.f32 %v3187_v4  ;;  %2216 = vst.msk [vmem:[#allocation2] sm:$0xff] %vm509_vm3, %v2214_v5  ;;  %v3516_v4 = vld [vmem:[%s5305_s6 + $0x48] sm:$0xff] }
0x158e   :  { %v4315_v5 = vpack.c.bf16 %v3516_v4, %v3515_v61 }
0x1590   :  { %v2392_v6 = vpop.permute.xlu1 %2391 }
0x1591   :  { %2394 = vst.msk [vmem:[#allocation2] sm:$0xff] %vm681_vm4, %v2392_v6  ;;  %v3517_v6 = vld [vmem:[%s5305_s6 + $0x50] sm:$0xff] }
0x1594   :  { %v2570_v7 = vpop.permute.xlu1 %2569 }
0x1595   :  { %2572 = vst.msk [vmem:[#allocation2] sm:$0xff] %vm853_vm5, %v2570_v7  ;;  %v3518_v7 = vld [vmem:[%s5305_s6 + $0x58] sm:$0xff] }
0x1597   :  { %v4491_v26 = vpop.eup %4490 }
0x1598   :  { %v3189_v8 = vsel %vm1947_vm7, %v4491_v26, 0.0 }
0x1599   :  { %3190 = vadd.xlane.f32.xlu0 %v3189_v8  ;;  %v3519_v8 = vld [vmem:[%s5305_s6 + $0x60] sm:$0xff] }
0x15af   :  { %4418 = vrot.lane.b32.xlu0 %v4997_v22, %s4576_s15  ;;  %v3278_v22 = vld [vmem:[#allocation2] sm:$0xff]  ;;  %s3642_s15 = sshll.u32 %s4585_s14, 4  ;;  %s3643_s15 = int_to_ptr.vmem [resolvable:$true] %s3642_s15 }
0x15b0   :  { %p4503_p1 = scmp.lt.s32.totalorder %s3643_s15, %s3643_s15 }
0x15b3   :  { %2918 = vrot.lane.b32.xlu0 %v2913_v39, %s4581_s19 }
0x15b7   :  { %3096 = vrot.lane.b32.xlu0 %v3091_v58, %s4582_s20  ;;  %v4303_v58 = vpack.c.bf16 %v3510_v38, %v3509_v57  ;;  %s4498_s20 = scalar_lea.vmem %s3643_s15, 1024 }
0x15b8   :  { %p4499_p0 = scmp.ne.s32.totalorder %s3643_s15, %s4498_s20  ;;  %p4504_p2 = scmp.lt.s32.totalorder %s4498_s20, %s4498_s20 }
0x15ba   :  { %p4505_p3 = por %p4504_p2, %p4503_p1 }
0x15bc   :  { %p4506_p4 = pnand %p4505_p3, %p4499_p0 }
0x1626   :  { %v3191_v28 = vpop.xlane.xlu0 %3190 }
0x1627   :  { %4492 = vrcp.f32 %v3191_v28  ;;  %v3520_v28 = vld [vmem:[%s5305_s6 + $0x68] sm:$0xff] }
0x162a   :  { %v4419_v62 = vpop.permute.xlu0 %4418 }
0x162b   :  { %v4421_v9 = vunpack.i.h.bf16 %v4419_v62  ;;  %v4420_v11 = vunpack.i.l.bf16 %v4419_v62  ;;  %v4323_v62 = vpack.c.bf16 %v3520_v28, %v3519_v8 }
0x162d   :  { %v4281_v14 = vpack.c.bf16 %v4421_v9, %v4420_v11 }
0x162e   :  { %v2919_v15 = vpop.permute.xlu0 %2918 }
0x162f   :  { %2921 = vst.msk [vmem:[#allocation2 + $0x8] sm:$0xff] %vm509_vm3, %v2919_v15  ;;  %4282 = vmatpush3.bf16.msra.mxu0 %v4281_v14 }
0x1630   :  { %4284 = vmatprep.subr.bf16.mxu0 %v4283_v0 }
0x1631   :  { %v4493_v16 = vpop.eup %4492 }
0x1632   :  { %v3193_v17 = vmul.f32 %v4493_v16, %v4491_v26  ;;  %v3097_v41 = vpop.permute.xlu0 %3096  ;;  %v4319_v26 = vpack.c.bf16 %v3518_v7, %v3517_v6 }
0x1633   :  { %3099 = vst.msk [vmem:[#allocation2 + $0x8] sm:$0xff] %vm681_vm4, %v3097_v41 }
0x1634   :  { %3624 = vst.msk [vmem:[#allocation7 + $0x38] sm:$0xff] %vm1947_vm7, %v3193_v17  ;;  %4136 = vmatmul.mubr.msk.f32.vlgmr.msra.gmra.mrb[30].mxu0 %vm1947_vm7, %v3193_v17 }
0x1635   :  { %4146 = vmatprep.mubr.msk.f32.mxu0 %vm42_vm0, %v3278_v22  ;;  %4286 = vmatpush3.bf16.msra.mxu0 %v4283_v0  ;;  %v3757_v22 = vld [vmem:[%s5306_s7 + $0x4] ss:$0 sm:$0xff] }
0x1636   :  { %4288 = vmatprep.subr.bf16.mxu0 %v4287_v25 }
0x1639   :  { %4290 = vmatpush3.bf16.msra.mxu0 %v4287_v25 }
0x163a   :  { %4300 = vmatprep.subr.bf16.mxu0 %v4299_v40 }
0x1707   :  { %v3269_v27 = vpop.f32.mrb[30].mxu0 }
0x1708   :  { %3274 = vrot.lane.b32.xlu1 %v3269_v27, %s4583_s21  ;;  %v4137_v29 = vpop.f32.mrb[31].mxu0 }
0x177a   :  { %v3275_v30 = vpop.permute.xlu1 %3274 }
0x177b   :  { %3277 = vst.msk [vmem:[#allocation2 + $0x8] sm:$0xff] %vm853_vm5, %v3275_v30  ;;  %v3521_v30 = vld [vmem:[%s5305_s6 + $0x70] sm:$0xff] }
0x1782   :  { %v3279_v31 = vld [vmem:[#allocation2 + $0x8] sm:$0xff] }
0x1783   :  { %4147 = vmatmul.mubr.msk.f32.vlgmr.msra.gmra.mrb[32].mxu0 %vm42_vm0, %v3279_v31  ;;  %v3522_v31 = vld [vmem:[%s5305_s6 + $0x78] sm:$0xff] }
0x1784   :  { %4302 = vmatpush3.bf16.msra.mxu0 %v4299_v40 }
0x1785   :  { %4304 = vmatprep.subr.bf16.mxu0 %v4303_v58 }
0x1788   :  { %4306 = vmatpush3.bf16.msra.mxu0 %v4303_v58 }
0x1789   :  { %4308 = vmatprep.subr.bf16.mxu0 %v4307_v63 }
0x178c   :  { %4310 = vmatpush3.bf16.msra.mxu0 %v4307_v63 }
0x178d   :  { %4312 = vmatprep.subr.bf16.mxu0 %v4311_v36 }
0x1790   :  { %4314 = vmatpush3.bf16.msra.mxu0 %v4311_v36 }
0x1791   :  { %4316 = vmatprep.subr.bf16.mxu0 %v4315_v5 }
0x1794   :  { %4318 = vmatpush3.bf16.msra.mxu0 %v4315_v5 }
0x1795   :  { %4320 = vmatprep.subr.bf16.mxu0 %v4319_v26 }
0x1798   :  { %4322 = vmatpush3.bf16.msra.mxu0 %v4319_v26 }
0x1799   :  { %4324 = vmatprep.subr.bf16.mxu0 %v4323_v62 }
0x179c   :  { %4326 = vmatpush3.bf16.msra.mxu0 %v4323_v62 }
0x1856   :  { %v4148_v32 = vpop.f32.mrb[32].mxu0 }
0x1857   :  { %v3367_v34 = vadd.f32 %v4148_v32, %v4880_v12  ;;  %v3357_v35 = vpop.f32.mrb[33].mxu0  ;;  %v4327_v32 = vpack.c.bf16 %v3522_v31, %v3521_v30 }
0x1858   :  { %v3366_v37 = vadd.f32 %v3357_v35, %v4882_v13 }
0x1859   :  { %v5159_v39 = vadd.f32 %v3756_v33, %v3367_v34  ;;  %4328 = vmatprep.subr.bf16.mxu0 %v4327_v32 }
0x185a   :  { %v5161_v42 = vadd.f32 %v3756_v33, %v3366_v37  ;;  %4330 = vmatpush3.bf16.msra.mxu0 %v4327_v32  ;;  %v3759_v33 = vld [vmem:[%s5306_s7 + $0xc] ss:$0 sm:$0xff] }
0x185b   :  { %v3380_v43 = vsel %vm42_vm0, %v5159_v39, 0.0 }
0x185c   :  { %3381 = vadd.xlane.f32.xlu1 %v3380_v43  ;;  %v3377_v44 = vsel %vm42_vm0, %v5161_v42, 0.0 }
0x185d   :  { %3378 = vadd.xlane.f32.xlu0 %v3377_v44 }
0x18e9   :  { %v3382_v45 = vpop.xlane.xlu1 %3381 }
0x18ea   :  { %v3384_v46 = vmul.f32 0.03125, %v3382_v45  ;;  %v3379_v47 = vpop.xlane.xlu0 %3378 }
0x18eb   :  { %v3383_v48 = vmul.f32 0.03125, %v3379_v47 }
0x18ec   :  { %v5168_v12 = vsub.f32 %v5159_v39, %v3384_v46 }
0x18ed   :  { %v3385_v13 = vsub.f32 %v5161_v42, %v3383_v48 }
0x18ee   :  { %v3388_v51 = vmul.f32 %v5168_v12, %v5168_v12 }
0x18ef   :  { %v3387_v49 = vmul.f32 %v3385_v13, %v3385_v13 }
0x18f0   :  { %v3392_v52 = vsel %vm42_vm0, %v3388_v51, 0.0 }
0x18f1   :  { %v3389_v50 = vsel %vm42_vm0, %v3387_v49, 0.0 }
0x18f2   :  { %3390 = vadd.xlane.f32.xlu0 %v3389_v50 }
0x18f6   :  { %3393 = vadd.xlane.f32.xlu0 %v3392_v52 }
0x197f   :  { %v3391_v9 = vpop.xlane.xlu0 %3390 }
0x1980   :  { %v3395_v11 = vmul.f32 0.03125, %v3391_v9 }
0x1982   :  { %v3397_v14 = vadd.f32 1e-05, %v3395_v11 }
0x1983   :  { %v3394_v15 = vpop.xlane.xlu0 %3393 }
0x1984   :  { %4494 = vrsqrt.f32 %v3397_v14  ;;  %v3396_v16 = vmul.f32 0.03125, %v3394_v15 }
0x1986   :  { %v3398_v17 = vadd.f32 1e-05, %v3396_v16 }
0x1988   :  { %4496 = vrsqrt.f32 %v3398_v17 }
0x198e   :  { %v4495_v41 = vpop.eup %4494 }
0x198f   :  { %v3401_v18 = vmul.f32 %v4495_v41, %v3385_v13 }
0x1991   :  { %v3407_v0 = vmul.f32 %v3757_v22, %v3401_v18 }
0x1992   :  { %v4497_v19 = vpop.eup %4496 }
0x1993   :  { %v3402_v24 = vmul.f32 %v4497_v19, %v5168_v12  ;;  %v3413_v25 = vadd.f32 %v3758_v1, %v3407_v0 }
0x1995   :  { %v3408_v27 = vmul.f32 %v3757_v22, %v3402_v24  ;;  %4157 = vmatprep.mubr.msk.f32.mxu1 %vm42_vm0, %v3413_v25 }
0x1997   :  { %v3414_v29 = vadd.f32 %v3758_v1, %v3408_v27 }
0x1999   :  { %4158 = vmatmul.mubr.msk.f32.vlgmr.msra.gmra.mrb[42].mxu1 %vm42_vm0, %v3414_v29 }
0x1a6c   :  { %v4159_v34 = vpop.f32.mrb[42].mxu1 }
0x1a6d   :  { %v3502_v35 = vadd.f32 %v4159_v34, %v3759_v33  ;;  %v3496_v37 = vpop.f32.mrb[43].mxu1 }
0x1a6e   :  { %v3497_v43 = vadd.f32 %v3759_v33, %v3496_v37 }
0x1a6f   :  { %v3506_v45 = vmax.f32 %v3502_v35, 0.0 }
0x1a70   :  { %v3505_v44 = vmax.f32 %v3497_v43, 0.0 }
0x1a72   :  { %4192 = vmatprep.mubr.f32.mxu0 %v3505_v44 }
0x1a73   :  { %4193 = vmatmul.mubr.f32.vlgmr.msra.gmra.mrb[34].mxu0 %v3506_v45 }
0x1a74   :  { %4509 = shalt.err (!%p4506_p4)
}
0x1a75   :  { %s4510_s2 = scalar_lea.hbm %s5308_s9, 1024 }
0x1a76   :  { %p4511_p5 = scmp.ne.s32.totalorder %s5308_s9, %s4510_s2  ;;  %p4514_p6 = scmp.lt.u32.totalorder %s4510_s2, %s5308_s9 }
0x1a78   :  { %p4516_p7 = pnand %p4514_p6, %p4511_p5 }
0x1a7a   :  { %4519 = shalt.err (!%p4516_p7)
}
0x1a7b   :  { %s4586_s16 = smov 128   ;;  %s4587_s18 = smov [#allocation7]  }
0x1a7c   :  { %3648 = dma.vmem_to_hbm [thread:$0]  %s3643_s15, 1024, %s5308_s9, [#allocation6], %s4586_s16, %s4586_s16, %s4581_s19  }
0x1a7d   :  { %s3654_s4 = sshll.u32 %s4587_s18, 4  ;;  %s3655_s4 = int_to_ptr.vmem [resolvable:$true] %s3654_s4 }
0x1a7e   :  { %s4520_s22 = scalar_lea.vmem %s3655_s4, 1024  ;;  %p4525_p9 = scmp.lt.s32.totalorder %s3655_s4, %s3655_s4 }
0x1a7f   :  { %p4521_p8 = scmp.ne.s32.totalorder %s3655_s4, %s4520_s22  ;;  %p4526_p10 = scmp.lt.s32.totalorder %s4520_s22, %s4520_s22 }
0x1a81   :  { %p4527_p11 = por %p4526_p10, %p4525_p9 }
0x1a83   :  { %p4528_p12 = pnand %p4527_p11, %p4521_p8 }
0x1a85   :  { %4531 = shalt.err (!%p4528_p12)
}
0x1a86   :  { %s4532_s25 = scalar_lea.hbm %s5309_s10, 1024 }
0x1a87   :  { %p4533_p13 = scmp.ne.s32.totalorder %s5309_s10, %s4532_s25  ;;  %p4536_p0 = scmp.lt.u32.totalorder %s4532_s25, %s5309_s10 }
0x1a89   :  { %p4538_p1 = pnand %p4536_p0, %p4533_p13 }
0x1a8b   :  { %4541 = shalt.err (!%p4538_p1)
}
0x1a8c   :  { %3660 = dma.vmem_to_hbm [thread:$0]  %s3655_s4, 1024, %s5309_s10, [#allocation6], %s4586_s16, %s4586_s16, %s4581_s19  }
0x1a8d   :  { %v3762_v47 = vld [vmem:[%s5306_s7 + $0x9] ss:$0 sm:$0xff]  ;;  %s4588_s14 = smov [#allocation3]  }
0x1a8e   :  { %s3630_s15 = sshll.u32 %s4588_s14, 4  ;;  %s3631_s15 = int_to_ptr.vmem [resolvable:$true] %s3630_s15 }
0x1a8f   :  { %s4542_s10 = scalar_lea.vmem %s3631_s15, 256  ;;  %p4547_p3 = scmp.lt.s32.totalorder %s3631_s15, %s3631_s15 }
0x1a90   :  { %p4543_p2 = scmp.ne.s32.totalorder %s3631_s15, %s4542_s10  ;;  %p4548_p4 = scmp.lt.s32.totalorder %s4542_s10, %s4542_s10 }
0x1a92   :  { %p4549_p5 = por %p4548_p4, %p4547_p3 }
0x1a94   :  { %p4550_p6 = pnand %p4549_p5, %p4543_p2 }
0x1b46   :  { %v4194_v46 = vpop.f32.mrb[34].mxu0 }
0x1b47   :  { %v3599_v48 = vadd.f32 %v4194_v46, %v5159_v39  ;;  %v3589_v12 = vpop.f32.mrb[35].mxu0 }
0x1b48   :  { %v3598_v13 = vadd.f32 %v3589_v12, %v5161_v42 }
0x1b49   :  { %v3606_v49 = vadd.f32 %v3762_v47, %v3599_v48 }
0x1b4a   :  { %v3605_v50 = vadd.f32 %v3762_v47, %v3598_v13 }
0x1b4b   :  { %3608 = vst.msk [vmem:[#allocation3 + $0x8] sm:$0xff] %vm42_vm0, %v3606_v49 }
0x1b4c   :  { %3607 = vst.msk [vmem:[#allocation3] sm:$0xff] %vm42_vm0, %v3605_v50 }
0x1b4d   :  { %4553 = shalt.err (!%p4550_p6)
}
0x1b4e   :  { %s4554_s6 = scalar_lea.hbm %s5307_s8, 256 }
0x1b4f   :  { %p4555_p7 = scmp.ne.s32.totalorder %s5307_s8, %s4554_s6  ;;  %p4558_p8 = scmp.lt.u32.totalorder %s4554_s6, %s5307_s8 }
0x1b51   :  { %p4560_p9 = pnand %p4558_p8, %p4555_p7 }
0x1b53   :  { %4563 = shalt.err (!%p4560_p9)
}
0x1b54   :  { %3636 = dma.vmem_to_hbm [thread:$0]  %s3631_s15, 256, %s5307_s8, [#allocation4], %s4586_s16, %s4586_s16, %s4581_s19  }
0x1b55   :  { %4564 = dma.done.wait [#allocation4], 256  }
0x1b56   :  { %4565 = vsyncadd [#allocation4], 4294967040 }
0x1b57   :  { %4566 = dma.done.wait [#allocation6], 2048  }
0x1b58   :  { %4567 = vsyncadd [#allocation6], 4294965248 }
0x1b59   :  { %3670 = vsyncpa [#allocation4], 1 }
0x1b5a   :  { %3671 = vsyncpa [#allocation6], 1 }

</bundles_post_ra>
